<compile_context>
chip_gen: v6e
topology: v6e:2x2x1
jax: 0.10.0
libtpu: 0.0.40
codegen_flags: <defaults>
</compile_context>

<pallas_src>
import jax
import jax.numpy as jnp
import numpy as np
from jax import lax
from jax.experimental import pallas as pl
from jax.experimental.pallas import tpu as pltpu

K = 15            # conv kernel size
PAD = 7           # conv "same" padding per side (PyTorch padding=7)
PADL = 8          # left/right pad used in the kernel layout (8-aligned residual read)
EPS = 1e-5        # BatchNorm eps
LANE = 128        # channel dim padded to a multiple of this (lane-dense)


def basic_block_kernel(xpad_ref, w1_ref, g1_ref, be1_ref,
                       w2_ref, g2_ref, be2_ref,
                       out_ref, mid_ref):
    """One invocation processes the whole (small) batch.

    xpad_ref : (N, L+16, Cp) f32   input, zero-padded 8 rows each side, channels->Cp
    w1_ref   : (K*Cp, Cp)    bf16  conv1 weights, tap-major rows
    g1/be1   : (1, Cp)       f32   BN1 gamma / beta (gamma zero-padded beyond Cout)
    w2_ref   : (K*Cp, Cp)    bf16  conv2 weights
    g2/be2   : (1, Cp)       f32   BN2 gamma / beta
    out_ref  : (N, L, Cp)    f32
    mid_ref  : (N, L+16, Cp) bf16  scratch: padded conv1 activations

    Conv biases are intentionally omitted: training-mode BN subtracts the batch
    mean, which exactly cancels any per-channel constant added before it.
    """
    N, _, Cp = xpad_ref.shape
    L = out_ref.shape[1]
    inv_cnt = 1.0 / float(N * L)

    # ---- conv1: one im2col matmul (bf16 x bf16 -> f32 on the MXU) ----------------
    x_bf = xpad_ref[...].astype(jnp.bfloat16)                         # (N, L+16, Cp)
    # output position l needs padded rows l+1 .. l+15 (left pad is 8 = PAD + 1)
    win1 = jnp.concatenate(
        [x_bf[:, k + 1:k + 1 + L, :] for k in range(K)], axis=-1)     # (N, L, K*Cp)
    acc1 = lax.dot_general(
        win1, w1_ref[...],
        dimension_numbers=(((2,), (0,)), ((), ())),
        preferred_element_type=jnp.float32)                           # (N, L, Cp) f32

    # ---- BN1 (training-mode batch stats, fused single pass) + ReLU ---------------
    s1 = jnp.sum(acc1, axis=(0, 1))                                   # (Cp,)
    q1 = jnp.sum(acc1 * acc1, axis=(0, 1))                            # (Cp,)
    mean1 = s1 * inv_cnt
    var1 = jnp.maximum(q1 * inv_cnt - mean1 * mean1, 0.0)
    scale1 = g1_ref[0] * lax.rsqrt(var1 + EPS)                        # EUP rsqrt
    shift1 = be1_ref[0] - mean1 * scale1
    h = jnp.maximum(acc1 * scale1 + shift1, 0.0)                      # (N, L, Cp) f32

    # ---- padded intermediate in bf16 scratch: zero only the halo strips ----------
    mid_ref[:, 0:PADL, :] = jnp.zeros((N, PADL, Cp), jnp.bfloat16)
    mid_ref[:, PADL + L:2 * PADL + L, :] = jnp.zeros((N, PADL, Cp), jnp.bfloat16)
    mid_ref[:, PADL:PADL + L, :] = h.astype(jnp.bfloat16)

    # ---- conv2: one im2col matmul, taps sliced directly off the scratch ref ------
    win2 = jnp.concatenate(
        [mid_ref[:, k + 1:k + 1 + L, :] for k in range(K)], axis=-1)  # (N, L, K*Cp)
    acc2 = lax.dot_general(
        win2, w2_ref[...],
        dimension_numbers=(((2,), (0,)), ((), ())),
        preferred_element_type=jnp.float32)                           # (N, L, Cp) f32

    # ---- BN2 (single pass) --------------------------------------------------------
    s2 = jnp.sum(acc2, axis=(0, 1))
    q2 = jnp.sum(acc2 * acc2, axis=(0, 1))
    mean2 = s2 * inv_cnt
    var2 = jnp.maximum(q2 * inv_cnt - mean2 * mean2, 0.0)
    scale2 = g2_ref[0] * lax.rsqrt(var2 + EPS)
    shift2 = be2_ref[0] - mean2 * scale2

    # ---- residual add (downsample=None, stride=1) + ReLU --------------------------
    identity = xpad_ref[:, PADL:PADL + L, :]                          # 8-aligned f32 read
    out_ref[...] = jnp.maximum(acc2 * scale2 + shift2 + identity, 0.0)


def _pad_channels(a, axis, cp):
    pad_width = [(0, 0)] * a.ndim
    pad_width[axis] = (0, cp - a.shape[axis])
    return jnp.pad(a, pad_width)


@jax.jit
def basic_block(x_ncl, w1, b1, g1, be1, w2, b2, g2, be2):
    """x_ncl: (N, Cin, L) input (PyTorch NCL layout).

    Conv weights are tap-major channels-last: (K, Cin, Cout); BN params (1, C).
    b1/b2 are accepted for interface parity but not used by the kernel
    (training-mode BN cancels a per-channel constant bias exactly).
    """
    del b1, b2
    x_ncl = x_ncl.astype(jnp.float32)                                 # x.float()
    N, Cin, L = x_ncl.shape
    Cout = w1.shape[2]
    assert Cin == Cout, "downsample=None requires in_channels == out_channels"

    Cp = ((Cout + LANE - 1) // LANE) * LANE                           # lane-dense channels

    # input: NCL -> NLC, zero-pad channels to Cp, zero-pad L by 8 each side
    x_nlc = jnp.transpose(x_ncl, (0, 2, 1))                           # (N, L, Cin)
    x_nlc = _pad_channels(x_nlc, 2, Cp)                               # (N, L, Cp)
    xpad = jnp.pad(x_nlc, ((0, 0), (PADL, PADL), (0, 0)))             # (N, L+16, Cp)

    # weights: pad channels, flatten tap-major to (K*Cp, Cp), cast bf16
    def prep_w(w):
        w = _pad_channels(_pad_channels(w.astype(jnp.float32), 1, Cp), 2, Cp)
        return w.reshape(K * Cp, Cp).astype(jnp.bfloat16)

    w1f, w2f = prep_w(w1), prep_w(w2)

    # BN params: zero-pad (zero gamma keeps padded channels identically zero)
    def prep_v(v):
        return _pad_channels(v.astype(jnp.float32), 1, Cp)            # (1, Cp)

    g1p, be1p, g2p, be2p = prep_v(g1), prep_v(be1), prep_v(g2), prep_v(be2)

    vec_spec = pl.BlockSpec((1, Cp), lambda i: (0, 0))
    w_spec = pl.BlockSpec((K * Cp, Cp), lambda i: (0, 0))

    out_nlc = pl.pallas_call(
        basic_block_kernel,
        out_shape=jax.ShapeDtypeStruct((N, L, Cp), jnp.float32),
        grid_spec=pltpu.PrefetchScalarGridSpec(
            num_scalar_prefetch=0,
            # TODO(synk): for large N*L, tile the grid over L (14-row halos) and/or N
            # and restructure the training-mode BN stats as a two-pass
            # (accumulate + finalize) reduction; that also enables a "parallel"
            # axis for the second v7x TensorCore and DMA/compute pipelining.
            grid=(1,),
            in_specs=[
                pl.BlockSpec((N, L + 2 * PADL, Cp), lambda i: (0, 0, 0)),
                w_spec,                                                # w1
                vec_spec,                                              # g1
                vec_spec,                                              # be1
                w_spec,                                                # w2
                vec_spec,                                              # g2
                vec_spec,                                              # be2
            ],
            out_specs=pl.BlockSpec((N, L, Cp), lambda i: (0, 0, 0)),
            scratch_shapes=[pltpu.VMEM((N, L + 2 * PADL, Cp), jnp.bfloat16)],
        ),
        compiler_params=pltpu.CompilerParams(
            dimension_semantics=("arbitrary",),
            vmem_limit_bytes=32 * 1024 * 1024),
    )(xpad, w1f, g1p, be1p, w2f, g2p, be2p)

    out_nlc = out_nlc[:, :, :Cout]                                     # drop channel padding
    return jnp.transpose(out_nlc, (0, 2, 1))                           # NLC -> NCL


# ---------------- pure-JAX f32 reference (for the correctness check) ----------------
def _ref_basic_block(x_ncl, w1, b1, g1, be1, w2, b2, g2, be2):
    x = x_ncl.astype(jnp.float32)

    def conv1d(x, w_tap_major, b):                                     # w: (K, Ci, Co)
        w_oik = jnp.transpose(w_tap_major, (2, 1, 0))                  # -> (Co, Ci, K)
        y = lax.conv_general_dilated(
            x, w_oik, window_strides=(1,), padding=[(PAD, PAD)],
            dimension_numbers=('NCH', 'OIH', 'NCH'))
        return y + b.reshape(1, -1, 1)

    def bn_train(y, g, be):
        m = jnp.mean(y, axis=(0, 2), keepdims=True)
        v = jnp.mean((y - m) ** 2, axis=(0, 2), keepdims=True)
        return (y - m) * (g.reshape(1, -1, 1) * lax.rsqrt(v + EPS)) \
            + be.reshape(1, -1, 1)

    out = jax.nn.relu(bn_train(conv1d(x, w1, b1[0]), g1[0], be1[0]))
    out = bn_train(conv1d(out, w2, b2[0]), g2[0], be2[0])
    return jax.nn.relu(out + x)


if __name__ == "__main__":
    N, Cin, Cout, L = 2, 4, 4, 16    # downsample=None => Cin == Cout, stride == 1

    key = jax.random.PRNGKey(0)
    ks = jax.random.split(key, 9)
    x = jax.random.normal(ks[0], (N, Cin, L), dtype=jnp.float32)

    # Conv weights stored tap-major / channels-last: (K, Cin, Cout)
    fan1 = Cin * K
    w1 = jax.random.uniform(ks[1], (K, Cin, Cout), jnp.float32,
                            -1.0 / np.sqrt(fan1), 1.0 / np.sqrt(fan1))
    b1 = jax.random.uniform(ks[2], (1, Cout), jnp.float32,
                            -1.0 / np.sqrt(fan1), 1.0 / np.sqrt(fan1))
    fan2 = Cout * K
    w2 = jax.random.uniform(ks[3], (K, Cout, Cout), jnp.float32,
                            -1.0 / np.sqrt(fan2), 1.0 / np.sqrt(fan2))
    b2 = jax.random.uniform(ks[4], (1, Cout), jnp.float32,
                            -1.0 / np.sqrt(fan2), 1.0 / np.sqrt(fan2))
    # BN affine params (nontrivial values; PyTorch init is gamma=1, beta=0)
    g1 = 1.0 + 0.1 * jax.random.normal(ks[5], (1, Cout), jnp.float32)
    be1 = 0.1 * jax.random.normal(ks[6], (1, Cout), jnp.float32)
    g2 = 1.0 + 0.1 * jax.random.normal(ks[7], (1, Cout), jnp.float32)
    be2 = 0.1 * jax.random.normal(ks[8], (1, Cout), jnp.float32)

    out = basic_block(x, w1, b1, g1, be1, w2, b2, g2, be2)
    out = jax.block_until_ready(out)

    ref = jax.block_until_ready(
        _ref_basic_block(x, w1, b1, g1, be1, w2, b2, g2, be2))
    err = float(jnp.max(jnp.abs(out - ref)))
    assert out.shape == (N, Cout, L), f"bad shape {out.shape}"
    # bf16 MXU operands vs f32 reference => relaxed tolerance
    assert err < 5e-2, f"mismatch vs reference: {err}"

    print("KERNEL_OK")
</pallas_src>

<mosaic_0001>
module attributes {stable_mosaic.version = 11 : i64} {
  func.func @basic_block_kernel(%arg0: i32, %arg1: memref<2x32x128xf32, #tpu.memory_space<vmem>>, %arg2: memref<1920x128xbf16, #tpu.memory_space<vmem>>, %arg3: memref<1x128xf32, #tpu.memory_space<vmem>>, %arg4: memref<1x128xf32, #tpu.memory_space<vmem>>, %arg5: memref<1920x128xbf16, #tpu.memory_space<vmem>>, %arg6: memref<1x128xf32, #tpu.memory_space<vmem>>, %arg7: memref<1x128xf32, #tpu.memory_space<vmem>>, %arg8: memref<2x16x128xf32, #tpu.memory_space<vmem>>, %arg9: memref<2x32x128xbf16, #tpu.memory_space<vmem>>) attributes {dimension_semantics = [#tpu.dimension_semantics<arbitrary>], iteration_bounds = array<i64: 1>, scalar_prefetch = 0 : i64, scratch_operands = 1 : i64, tpu.core_type = #tpu.core_type<tc>, window_params = [{pipeline_mode = #tpu.pipeline_mode<synchronous>, transform_indices = @transform_0, window_bounds = array<i64: 2, 32, 128>}, {pipeline_mode = #tpu.pipeline_mode<synchronous>, transform_indices = @transform_1, window_bounds = array<i64: 1920, 128>}, {pipeline_mode = #tpu.pipeline_mode<synchronous>, transform_indices = @transform_2, window_bounds = array<i64: 1, 128>}, {pipeline_mode = #tpu.pipeline_mode<synchronous>, transform_indices = @transform_3, window_bounds = array<i64: 1, 128>}, {pipeline_mode = #tpu.pipeline_mode<synchronous>, transform_indices = @transform_4, window_bounds = array<i64: 1920, 128>}, {pipeline_mode = #tpu.pipeline_mode<synchronous>, transform_indices = @transform_5, window_bounds = array<i64: 1, 128>}, {pipeline_mode = #tpu.pipeline_mode<synchronous>, transform_indices = @transform_6, window_bounds = array<i64: 1, 128>}, {pipeline_mode = #tpu.pipeline_mode<synchronous>, transform_indices = @transform_7, window_bounds = array<i64: 2, 16, 128>}]} {
    %c0 = arith.constant 0 : index
    %c0_0 = arith.constant 0 : index
    %c0_1 = arith.constant 0 : index
    %0 = vector.load %arg1[%c0, %c0_0, %c0_1] : memref<2x32x128xf32, #tpu.memory_space<vmem>>, vector<2x32x128xf32>
    %1 = arith.truncf %0 : vector<2x32x128xf32> to vector<2x32x128xbf16>
    %2 = vector.extract_strided_slice %1 {offsets = [0, 1, 0], sizes = [2, 16, 128], strides = [1, 1, 1]} : vector<2x32x128xbf16> to vector<2x16x128xbf16>
    %3 = vector.extract_strided_slice %1 {offsets = [0, 2, 0], sizes = [2, 16, 128], strides = [1, 1, 1]} : vector<2x32x128xbf16> to vector<2x16x128xbf16>
    %4 = vector.extract_strided_slice %1 {offsets = [0, 3, 0], sizes = [2, 16, 128], strides = [1, 1, 1]} : vector<2x32x128xbf16> to vector<2x16x128xbf16>
    %5 = vector.extract_strided_slice %1 {offsets = [0, 4, 0], sizes = [2, 16, 128], strides = [1, 1, 1]} : vector<2x32x128xbf16> to vector<2x16x128xbf16>
    %6 = vector.extract_strided_slice %1 {offsets = [0, 5, 0], sizes = [2, 16, 128], strides = [1, 1, 1]} : vector<2x32x128xbf16> to vector<2x16x128xbf16>
    %7 = vector.extract_strided_slice %1 {offsets = [0, 6, 0], sizes = [2, 16, 128], strides = [1, 1, 1]} : vector<2x32x128xbf16> to vector<2x16x128xbf16>
    %8 = vector.extract_strided_slice %1 {offsets = [0, 7, 0], sizes = [2, 16, 128], strides = [1, 1, 1]} : vector<2x32x128xbf16> to vector<2x16x128xbf16>
    %9 = vector.extract_strided_slice %1 {offsets = [0, 8, 0], sizes = [2, 16, 128], strides = [1, 1, 1]} : vector<2x32x128xbf16> to vector<2x16x128xbf16>
    %10 = vector.extract_strided_slice %1 {offsets = [0, 9, 0], sizes = [2, 16, 128], strides = [1, 1, 1]} : vector<2x32x128xbf16> to vector<2x16x128xbf16>
    %11 = vector.extract_strided_slice %1 {offsets = [0, 10, 0], sizes = [2, 16, 128], strides = [1, 1, 1]} : vector<2x32x128xbf16> to vector<2x16x128xbf16>
    %12 = vector.extract_strided_slice %1 {offsets = [0, 11, 0], sizes = [2, 16, 128], strides = [1, 1, 1]} : vector<2x32x128xbf16> to vector<2x16x128xbf16>
    %13 = vector.extract_strided_slice %1 {offsets = [0, 12, 0], sizes = [2, 16, 128], strides = [1, 1, 1]} : vector<2x32x128xbf16> to vector<2x16x128xbf16>
    %14 = vector.extract_strided_slice %1 {offsets = [0, 13, 0], sizes = [2, 16, 128], strides = [1, 1, 1]} : vector<2x32x128xbf16> to vector<2x16x128xbf16>
    %15 = vector.extract_strided_slice %1 {offsets = [0, 14, 0], sizes = [2, 16, 128], strides = [1, 1, 1]} : vector<2x32x128xbf16> to vector<2x16x128xbf16>
    %16 = vector.extract_strided_slice %1 {offsets = [0, 15, 0], sizes = [2, 16, 128], strides = [1, 1, 1]} : vector<2x32x128xbf16> to vector<2x16x128xbf16>
    %17 = tpu.concatenate %2, %3, %4, %5, %6, %7, %8, %9, %10, %11, %12, %13, %14, %15, %16 in 2 : vector<2x16x128xbf16>, vector<2x16x128xbf16>, vector<2x16x128xbf16>, vector<2x16x128xbf16>, vector<2x16x128xbf16>, vector<2x16x128xbf16>, vector<2x16x128xbf16>, vector<2x16x128xbf16>, vector<2x16x128xbf16>, vector<2x16x128xbf16>, vector<2x16x128xbf16>, vector<2x16x128xbf16>, vector<2x16x128xbf16>, vector<2x16x128xbf16>, vector<2x16x128xbf16> -> vector<2x16x1920xbf16>
    %c0_2 = arith.constant 0 : index
    %c0_3 = arith.constant 0 : index
    %18 = vector.load %arg2[%c0_2, %c0_3] : memref<1920x128xbf16, #tpu.memory_space<vmem>>, vector<1920x128xbf16>
    %cst = arith.constant dense<0.000000e+00> : vector<2x16x128xf32>
    %19 = tpu.matmul %17, %18, %cst {dimension_numbers = #tpu.dot_dimension_numbers<[2], [0], [0, 1], [1], [0, 0, 0, 1, 1, 1], [], []>} : vector<2x16x1920xbf16>, vector<1920x128xbf16>, vector<2x16x128xf32> -> vector<2x16x128xf32>
    %cst_4 = arith.constant dense<0.000000e+00> : vector<128xf32>
    %20 = vector.multi_reduction <add>, %19, %cst_4 [0, 1] : vector<2x16x128xf32> to vector<128xf32>
    %21 = arith.mulf %19, %19 : vector<2x16x128xf32>
    %cst_5 = arith.constant dense<0.000000e+00> : vector<128xf32>
    %22 = vector.multi_reduction <add>, %21, %cst_5 [0, 1] : vector<2x16x128xf32> to vector<128xf32>
    %cst_6 = arith.constant 3.125000e-02 : f32
    %23 = vector.broadcast %cst_6 : f32 to vector<128xf32>
    %24 = arith.mulf %20, %23 : vector<128xf32>
    %cst_7 = arith.constant 3.125000e-02 : f32
    %25 = vector.broadcast %cst_7 : f32 to vector<128xf32>
    %26 = arith.mulf %22, %25 : vector<128xf32>
    %27 = arith.mulf %24, %24 : vector<128xf32>
    %28 = arith.subf %26, %27 : vector<128xf32>
    %cst_8 = arith.constant 0.000000e+00 : f32
    %29 = vector.broadcast %cst_8 : f32 to vector<128xf32>
    %30 = arith.maximumf %28, %29 : vector<128xf32>
    %c0_9 = arith.constant 0 : index
    %c0_10 = arith.constant 0 : index
    %31 = vector.load %arg3[%c0_9, %c0_10] : memref<1x128xf32, #tpu.memory_space<vmem>>, vector<1x128xf32>
    %32 = vector.shape_cast %31 : vector<1x128xf32> to vector<128xf32>
    %cst_11 = arith.constant 9.99999974E-6 : f32
    %33 = vector.broadcast %cst_11 : f32 to vector<128xf32>
    %34 = arith.addf %30, %33 : vector<128xf32>
    %35 = math.rsqrt %34 : vector<128xf32>
    %36 = arith.mulf %32, %35 : vector<128xf32>
    %c0_12 = arith.constant 0 : index
    %c0_13 = arith.constant 0 : index
    %37 = vector.load %arg4[%c0_12, %c0_13] : memref<1x128xf32, #tpu.memory_space<vmem>>, vector<1x128xf32>
    %38 = vector.shape_cast %37 : vector<1x128xf32> to vector<128xf32>
    %39 = arith.mulf %24, %36 : vector<128xf32>
    %40 = arith.subf %38, %39 : vector<128xf32>
    %41 = vector.shape_cast %36 : vector<128xf32> to vector<1x1x128xf32>
    %42 = vector.broadcast %41 : vector<1x1x128xf32> to vector<2x16x128xf32>
    %43 = arith.mulf %19, %42 : vector<2x16x128xf32>
    %44 = vector.shape_cast %40 : vector<128xf32> to vector<1x1x128xf32>
    %45 = vector.broadcast %44 : vector<1x1x128xf32> to vector<2x16x128xf32>
    %46 = arith.addf %43, %45 : vector<2x16x128xf32>
    %cst_14 = arith.constant 0.000000e+00 : f32
    %47 = vector.broadcast %cst_14 : f32 to vector<2x16x128xf32>
    %48 = arith.maximumf %46, %47 : vector<2x16x128xf32>
    %cst_15 = arith.constant 0.000000e+00 : bf16
    %49 = vector.broadcast %cst_15 : bf16 to vector<2x8x128xbf16>
    %c0_16 = arith.constant 0 : index
    %c0_17 = arith.constant 0 : index
    %c0_18 = arith.constant 0 : index
    %50 = vector.load %arg9[%c0_16, %c0_17, %c0_18] : memref<2x32x128xbf16, #tpu.memory_space<vmem>>, vector<2x8x128xbf16>
    tpu.vector_store %arg9[%c0_16, %c0_17, %c0_18], %49 {strides = array<i32>} : memref<2x32x128xbf16, #tpu.memory_space<vmem>>, vector<2x8x128xbf16>,
    %cst_19 = arith.constant 0.000000e+00 : bf16
    %51 = vector.broadcast %cst_19 : bf16 to vector<2x8x128xbf16>
    %c0_20 = arith.constant 0 : index
    %c24 = arith.constant 24 : index
    %c0_21 = arith.constant 0 : index
    %52 = vector.load %arg9[%c0_20, %c24, %c0_21] : memref<2x32x128xbf16, #tpu.memory_space<vmem>>, vector<2x8x128xbf16>
    tpu.vector_store %arg9[%c0_20, %c24, %c0_21], %51 {strides = array<i32>} : memref<2x32x128xbf16, #tpu.memory_space<vmem>>, vector<2x8x128xbf16>,
    %53 = arith.truncf %48 : vector<2x16x128xf32> to vector<2x16x128xbf16>
    %c0_22 = arith.constant 0 : index
    %c8 = arith.constant 8 : index
    %c0_23 = arith.constant 0 : index
    %54 = vector.load %arg9[%c0_22, %c8, %c0_23] : memref<2x32x128xbf16, #tpu.memory_space<vmem>>, vector<2x16x128xbf16>
    tpu.vector_store %arg9[%c0_22, %c8, %c0_23], %53 {strides = array<i32>} : memref<2x32x128xbf16, #tpu.memory_space<vmem>>, vector<2x16x128xbf16>,
    %c0_24 = arith.constant 0 : index
    %c1 = arith.constant 1 : index
    %c0_25 = arith.constant 0 : index
    %55 = vector.load %arg9[%c0_24, %c1, %c0_25] : memref<2x32x128xbf16, #tpu.memory_space<vmem>>, vector<2x16x128xbf16>
    %c0_26 = arith.constant 0 : index
    %c2 = arith.constant 2 : index
    %c0_27 = arith.constant 0 : index
    %56 = vector.load %arg9[%c0_26, %c2, %c0_27] : memref<2x32x128xbf16, #tpu.memory_space<vmem>>, vector<2x16x128xbf16>
    %c0_28 = arith.constant 0 : index
    %c3 = arith.constant 3 : index
    %c0_29 = arith.constant 0 : index
    %57 = vector.load %arg9[%c0_28, %c3, %c0_29] : memref<2x32x128xbf16, #tpu.memory_space<vmem>>, vector<2x16x128xbf16>
    %c0_30 = arith.constant 0 : index
    %c4 = arith.constant 4 : index
    %c0_31 = arith.constant 0 : index
    %58 = vector.load %arg9[%c0_30, %c4, %c0_31] : memref<2x32x128xbf16, #tpu.memory_space<vmem>>, vector<2x16x128xbf16>
    %c0_32 = arith.constant 0 : index
    %c5 = arith.constant 5 : index
    %c0_33 = arith.constant 0 : index
    %59 = vector.load %arg9[%c0_32, %c5, %c0_33] : memref<2x32x128xbf16, #tpu.memory_space<vmem>>, vector<2x16x128xbf16>
    %c0_34 = arith.constant 0 : index
    %c6 = arith.constant 6 : index
    %c0_35 = arith.constant 0 : index
    %60 = vector.load %arg9[%c0_34, %c6, %c0_35] : memref<2x32x128xbf16, #tpu.memory_space<vmem>>, vector<2x16x128xbf16>
    %c0_36 = arith.constant 0 : index
    %c7 = arith.constant 7 : index
    %c0_37 = arith.constant 0 : index
    %61 = vector.load %arg9[%c0_36, %c7, %c0_37] : memref<2x32x128xbf16, #tpu.memory_space<vmem>>, vector<2x16x128xbf16>
    %c0_38 = arith.constant 0 : index
    %c8_39 = arith.constant 8 : index
    %c0_40 = arith.constant 0 : index
    %62 = vector.load %arg9[%c0_38, %c8_39, %c0_40] : memref<2x32x128xbf16, #tpu.memory_space<vmem>>, vector<2x16x128xbf16>
    %c0_41 = arith.constant 0 : index
    %c9 = arith.constant 9 : index
    %c0_42 = arith.constant 0 : index
    %63 = vector.load %arg9[%c0_41, %c9, %c0_42] : memref<2x32x128xbf16, #tpu.memory_space<vmem>>, vector<2x16x128xbf16>
    %c0_43 = arith.constant 0 : index
    %c10 = arith.constant 10 : index
    %c0_44 = arith.constant 0 : index
    %64 = vector.load %arg9[%c0_43, %c10, %c0_44] : memref<2x32x128xbf16, #tpu.memory_space<vmem>>, vector<2x16x128xbf16>
    %c0_45 = arith.constant 0 : index
    %c11 = arith.constant 11 : index
    %c0_46 = arith.constant 0 : index
    %65 = vector.load %arg9[%c0_45, %c11, %c0_46] : memref<2x32x128xbf16, #tpu.memory_space<vmem>>, vector<2x16x128xbf16>
    %c0_47 = arith.constant 0 : index
    %c12 = arith.constant 12 : index
    %c0_48 = arith.constant 0 : index
    %66 = vector.load %arg9[%c0_47, %c12, %c0_48] : memref<2x32x128xbf16, #tpu.memory_space<vmem>>, vector<2x16x128xbf16>
    %c0_49 = arith.constant 0 : index
    %c13 = arith.constant 13 : index
    %c0_50 = arith.constant 0 : index
    %67 = vector.load %arg9[%c0_49, %c13, %c0_50] : memref<2x32x128xbf16, #tpu.memory_space<vmem>>, vector<2x16x128xbf16>
    %c0_51 = arith.constant 0 : index
    %c14 = arith.constant 14 : index
    %c0_52 = arith.constant 0 : index
    %68 = vector.load %arg9[%c0_51, %c14, %c0_52] : memref<2x32x128xbf16, #tpu.memory_space<vmem>>, vector<2x16x128xbf16>
    %c0_53 = arith.constant 0 : index
    %c15 = arith.constant 15 : index
    %c0_54 = arith.constant 0 : index
    %69 = vector.load %arg9[%c0_53, %c15, %c0_54] : memref<2x32x128xbf16, #tpu.memory_space<vmem>>, vector<2x16x128xbf16>
    %70 = tpu.concatenate %55, %56, %57, %58, %59, %60, %61, %62, %63, %64, %65, %66, %67, %68, %69 in 2 : vector<2x16x128xbf16>, vector<2x16x128xbf16>, vector<2x16x128xbf16>, vector<2x16x128xbf16>, vector<2x16x128xbf16>, vector<2x16x128xbf16>, vector<2x16x128xbf16>, vector<2x16x128xbf16>, vector<2x16x128xbf16>, vector<2x16x128xbf16>, vector<2x16x128xbf16>, vector<2x16x128xbf16>, vector<2x16x128xbf16>, vector<2x16x128xbf16>, vector<2x16x128xbf16> -> vector<2x16x1920xbf16>
    %c0_55 = arith.constant 0 : index
    %c0_56 = arith.constant 0 : index
    %71 = vector.load %arg5[%c0_55, %c0_56] : memref<1920x128xbf16, #tpu.memory_space<vmem>>, vector<1920x128xbf16>
    %cst_57 = arith.constant dense<0.000000e+00> : vector<2x16x128xf32>
    %72 = tpu.matmul %70, %71, %cst_57 {dimension_numbers = #tpu.dot_dimension_numbers<[2], [0], [0, 1], [1], [0, 0, 0, 1, 1, 1], [], []>} : vector<2x16x1920xbf16>, vector<1920x128xbf16>, vector<2x16x128xf32> -> vector<2x16x128xf32>
    %cst_58 = arith.constant dense<0.000000e+00> : vector<128xf32>
    %73 = vector.multi_reduction <add>, %72, %cst_58 [0, 1] : vector<2x16x128xf32> to vector<128xf32>
    %74 = arith.mulf %72, %72 : vector<2x16x128xf32>
    %cst_59 = arith.constant dense<0.000000e+00> : vector<128xf32>
    %75 = vector.multi_reduction <add>, %74, %cst_59 [0, 1] : vector<2x16x128xf32> to vector<128xf32>
    %cst_60 = arith.constant 3.125000e-02 : f32
    %76 = vector.broadcast %cst_60 : f32 to vector<128xf32>
    %77 = arith.mulf %73, %76 : vector<128xf32>
    %cst_61 = arith.constant 3.125000e-02 : f32
    %78 = vector.broadcast %cst_61 : f32 to vector<128xf32>
    %79 = arith.mulf %75, %78 : vector<128xf32>
    %80 = arith.mulf %77, %77 : vector<128xf32>
    %81 = arith.subf %79, %80 : vector<128xf32>
    %cst_62 = arith.constant 0.000000e+00 : f32
    %82 = vector.broadcast %cst_62 : f32 to vector<128xf32>
    %83 = arith.maximumf %81, %82 : vector<128xf32>
    %c0_63 = arith.constant 0 : index
    %c0_64 = arith.constant 0 : index
    %84 = vector.load %arg6[%c0_63, %c0_64] : memref<1x128xf32, #tpu.memory_space<vmem>>, vector<1x128xf32>
    %85 = vector.shape_cast %84 : vector<1x128xf32> to vector<128xf32>
    %cst_65 = arith.constant 9.99999974E-6 : f32
    %86 = vector.broadcast %cst_65 : f32 to vector<128xf32>
    %87 = arith.addf %83, %86 : vector<128xf32>
    %88 = math.rsqrt %87 : vector<128xf32>
    %89 = arith.mulf %85, %88 : vector<128xf32>
    %c0_66 = arith.constant 0 : index
    %c0_67 = arith.constant 0 : index
    %90 = vector.load %arg7[%c0_66, %c0_67] : memref<1x128xf32, #tpu.memory_space<vmem>>, vector<1x128xf32>
    %91 = vector.shape_cast %90 : vector<1x128xf32> to vector<128xf32>
    %92 = arith.mulf %77, %89 : vector<128xf32>
    %93 = arith.subf %91, %92 : vector<128xf32>
    %c0_68 = arith.constant 0 : index
    %c8_69 = arith.constant 8 : index
    %c0_70 = arith.constant 0 : index
    %94 = vector.load %arg1[%c0_68, %c8_69, %c0_70] : memref<2x32x128xf32, #tpu.memory_space<vmem>>, vector<2x16x128xf32>
    %95 = vector.shape_cast %89 : vector<128xf32> to vector<1x1x128xf32>
    %96 = vector.broadcast %95 : vector<1x1x128xf32> to vector<2x16x128xf32>
    %97 = arith.mulf %72, %96 : vector<2x16x128xf32>
    %98 = vector.shape_cast %93 : vector<128xf32> to vector<1x1x128xf32>
    %99 = vector.broadcast %98 : vector<1x1x128xf32> to vector<2x16x128xf32>
    %100 = arith.addf %97, %99 : vector<2x16x128xf32>
    %101 = arith.addf %100, %94 : vector<2x16x128xf32>
    %cst_71 = arith.constant 0.000000e+00 : f32
    %102 = vector.broadcast %cst_71 : f32 to vector<2x16x128xf32>
    %103 = arith.maximumf %101, %102 : vector<2x16x128xf32>
    %c0_72 = arith.constant 0 : index
    %c0_73 = arith.constant 0 : index
    %c0_74 = arith.constant 0 : index
    %104 = vector.load %arg8[%c0_72, %c0_73, %c0_74] : memref<2x16x128xf32, #tpu.memory_space<vmem>>, vector<2x16x128xf32>
    tpu.vector_store %arg8[%c0_72, %c0_73, %c0_74], %103 {strides = array<i32>} : memref<2x16x128xf32, #tpu.memory_space<vmem>>, vector<2x16x128xf32>,
    return
  }
  func.func @transform_0(%arg0: i32) -> (i32, i32, i32) {
    %c0_i32 = arith.constant 0 : i32
    %c0_i32_0 = arith.constant 0 : i32
    %c0_i32_1 = arith.constant 0 : i32
    %c0_i32_2 = arith.constant 0 : i32
    return %c0_i32, %c0_i32_0, %c0_i32_1 : i32, i32, i32
  }
  func.func @transform_1(%arg0: i32) -> (i32, i32) {
    %c0_i32 = arith.constant 0 : i32
    %c0_i32_0 = arith.constant 0 : i32
    %c0_i32_1 = arith.constant 0 : i32
    return %c0_i32, %c0_i32_0 : i32, i32
  }
  func.func @transform_2(%arg0: i32) -> (i32, i32) {
    %c0_i32 = arith.constant 0 : i32
    %c0_i32_0 = arith.constant 0 : i32
    %c0_i32_1 = arith.constant 0 : i32
    return %c0_i32, %c0_i32_0 : i32, i32
  }
  func.func @transform_3(%arg0: i32) -> (i32, i32) {
    %c0_i32 = arith.constant 0 : i32
    %c0_i32_0 = arith.constant 0 : i32
    %c0_i32_1 = arith.constant 0 : i32
    return %c0_i32, %c0_i32_0 : i32, i32
  }
  func.func @transform_4(%arg0: i32) -> (i32, i32) {
    %c0_i32 = arith.constant 0 : i32
    %c0_i32_0 = arith.constant 0 : i32
    %c0_i32_1 = arith.constant 0 : i32
    return %c0_i32, %c0_i32_0 : i32, i32
  }
  func.func @transform_5(%arg0: i32) -> (i32, i32) {
    %c0_i32 = arith.constant 0 : i32
    %c0_i32_0 = arith.constant 0 : i32
    %c0_i32_1 = arith.constant 0 : i32
    return %c0_i32, %c0_i32_0 : i32, i32
  }
  func.func @transform_6(%arg0: i32) -> (i32, i32) {
    %c0_i32 = arith.constant 0 : i32
    %c0_i32_0 = arith.constant 0 : i32
    %c0_i32_1 = arith.constant 0 : i32
    return %c0_i32, %c0_i32_0 : i32, i32
  }
  func.func @transform_7(%arg0: i32) -> (i32, i32, i32) {
    %c0_i32 = arith.constant 0 : i32
    %c0_i32_0 = arith.constant 0 : i32
    %c0_i32_1 = arith.constant 0 : i32
    %c0_i32_2 = arith.constant 0 : i32
    return %c0_i32, %c0_i32_0, %c0_i32_1 : i32, i32, i32
  }
}

</mosaic_0001>

<bundles_post_ra>
// kernel: basic_block.1
= control target key start
LH: loop header
LB: loop body
LE: loop exit
PB: predicated region body
PF: predicated region fallthrough
CT: control target
= control target key end

     0   :  { %vm39_vm0 = vsmask.f32 7424  ;;  %vm79_vm1 = vsmask.f32 6400  ;;  %vm72_vm2 = vcmask 1046528   ;;  %vm94_vm4 = vcmask 1045504   ;;  %s6584_s1 = inlined_call_operand.vmem [shape: bf16[1920,128], index: 1, kind: input, shape index: {}]   ;;  %s6585_s0 = inlined_call_operand.vmem [shape: f32[2,32,128], index: 0, kind: input, shape index: {}]   ;;  %s6586_s4 = inlined_call_operand.vmem [shape: bf16[1920,128], index: 4, kind: input, shape index: {}]   ;;  %s6587_s2 = inlined_call_operand.vmem [shape: f32[1,128], index: 2, kind: input, shape index: {}]   ;;  %s6588_s3 = inlined_call_operand.vmem [shape: f32[1,128], index: 3, kind: input, shape index: {}]   ;;  %s6589_s5 = inlined_call_operand.vmem [shape: f32[1,128], index: 5, kind: input, shape index: {}]   ;;  %s6590_s6 = inlined_call_operand.vmem [shape: f32[1,128], index: 6, kind: input, shape index: {}]   ;;  %s6591_s7 = inlined_call_operand.vmem [shape: f32[2,16,128], index: 7, kind: output, shape index: {}]  }
   0x1   :  { %v4930_v0 = vld [vmem:[%s6584_s1 + $0x78] sm:$0xff]   ;;  %v4934_v4 = vld [vmem:[%s6584_s1 + $0x70] sm:$0xff]   ;;  %v4938_v8 = vld [vmem:[%s6584_s1 + $0x68] sm:$0xff]   ;;  %vm101_vm3 = vsmask.f32 5376  ;;  %vm116_vm6 = vcmask 1044480  }
   0x2   :  { %v4931_v1 = vld [vmem:[%s6584_s1 + $0xf8] sm:$0xff]   ;;  %4477 = vmatprep.subr.bf16.mxu0 %v4930_v0  ;;  %v4935_v5 = vld [vmem:[%s6584_s1 + $0xf0] sm:$0xff]   ;;  %v4939_v9 = vld [vmem:[%s6584_s1 + $0xe8] sm:$0xff]   ;;  %vm123_vm5 = vsmask.f32 4352  ;;  %vm138_vm7 = vcmask 1043456  }
   0x3   :  { %v4932_v2 = vld [vmem:[%s6584_s1 + $0x38] sm:$0xff]   ;;  %4505 = vmatprep.subr.bf16.mxu1 %v4931_v1  ;;  %v4936_v6 = vld [vmem:[%s6584_s1 + $0x30] sm:$0xff]   ;;  %v4940_v10 = vld [vmem:[%s6584_s1 + $0x28] sm:$0xff]   ;;  %vm160_vm8 = vcmask 1042432   ;;  %vm145_vm9 = vsmask.f32 3328 }
   0x4   :  { %v4933_v3 = vld [vmem:[%s6584_s1 + $0xb8] sm:$0xff]   ;;  %4478 = vmatpush3.bf16.msra.mxu0 %v4932_v2  ;;  %v4937_v7 = vld [vmem:[%s6584_s1 + $0xb0] sm:$0xff]   ;;  %v4941_v11 = vld [vmem:[%s6584_s1 + $0xa8] sm:$0xff]   ;;  %vm167_vm10 = vsmask.f32 2304  ;;  %vm182_vm11 = vcmask 1041408  }
   0x5   :  { %4506 = vmatpush3.bf16.msra.mxu1 %v4933_v3  ;;  %4479 = vmatprep.subr.bf16.mxu0 %v4934_v4  ;;  %v4942_v12 = vld [vmem:[%s6584_s1 + $0x60] sm:$0xff]   ;;  %v4946_v16 = vld [vmem:[%s6584_s1 + $0x58] sm:$0xff]   ;;  %v4950_v20 = vld [vmem:[%s6584_s1 + $0x50] sm:$0xff]   ;;  %vm204_vm12 = vcmask 1040384   ;;  %vm189_vm13 = vsmask.f32 1280 }
   0x6   :  { %4507 = vmatprep.subr.bf16.mxu1 %v4935_v5  ;;  %v4943_v13 = vld [vmem:[%s6584_s1 + $0xe0] sm:$0xff]   ;;  %v4947_v17 = vld [vmem:[%s6584_s1 + $0xd8] sm:$0xff]   ;;  %v4951_v21 = vld [vmem:[%s6584_s1 + $0xd0] sm:$0xff]  }
   0x7   :  { %v4944_v14 = vld [vmem:[%s6584_s1 + $0x20] sm:$0xff]   ;;  %v4948_v18 = vld [vmem:[%s6584_s1 + $0x18] sm:$0xff]   ;;  %v4952_v22 = vld [vmem:[%s6584_s1 + $0x10] sm:$0xff]  }
   0x8   :  { %4480 = vmatpush3.bf16.msra.mxu0 %v4936_v6  ;;  %v4945_v15 = vld [vmem:[%s6584_s1 + $0xa0] sm:$0xff]   ;;  %v4949_v19 = vld [vmem:[%s6584_s1 + $0x98] sm:$0xff]   ;;  %v4953_v23 = vld [vmem:[%s6584_s1 + $0x90] sm:$0xff]  }
   0x9   :  { %4508 = vmatpush3.bf16.msra.mxu1 %v4937_v7  ;;  %4481 = vmatprep.subr.bf16.mxu0 %v4938_v8  ;;  %v4954_v24 = vld [vmem:[%s6584_s1 + $0x48] sm:$0xff]   ;;  %v4958_v28 = vld [vmem:[%s6584_s1 + $0x40] sm:$0xff]   ;;  %v29_v34 = vld [vmem:[%s6585_s0 + $0x10] sm:$0xff] }
   0xa   :  { %4509 = vmatprep.subr.bf16.mxu1 %v4939_v9  ;;  %v4955_v25 = vld [vmem:[%s6584_s1 + $0xc8] sm:$0xff]   ;;  %v4959_v29 = vld [vmem:[%s6584_s1 + $0xc0] sm:$0xff]   ;;  %v30_v35 = vld [vmem:[%s6585_s0 + $0x18] sm:$0xff] }
   0xb   :  { %v4956_v26 = vld [vmem:[%s6584_s1 + $0x8] sm:$0xff]   ;;  %v4960_v30 = vld [vmem:[%s6584_s1] sm:$0xff]   ;;  %v5358_v37 = vpack.c.bf16 %v30_v35, %v29_v34  ;;  %v4962_v38 = vld [vmem:[%s6584_s1 + $0x178] sm:$0xff]  }
   0xc   :  { %4482 = vmatpush3.bf16.msra.mxu0 %v4940_v10  ;;  %v4957_v27 = vld [vmem:[%s6584_s1 + $0x88] sm:$0xff]   ;;  %v4961_v31 = vld [vmem:[%s6584_s1 + $0x80] sm:$0xff]   ;;  %v4964_v45 = vld [vmem:[%s6584_s1 + $0x1f8] sm:$0xff]  }
   0xd   :  { %4510 = vmatpush3.bf16.msra.mxu1 %v4941_v11  ;;  %4483 = vmatprep.subr.bf16.mxu0 %v4942_v12  ;;  %v27_v32 = vld [vmem:[%s6585_s0] sm:$0xff]  ;;  %v28_v33 = vld [vmem:[%s6585_s0 + $0x8] sm:$0xff]  ;;  %v5371_v42 = vshll.u32 %v5358_v37, 16  ;;  %v5374_v43 = vshrl.u32 %v5358_v37, 16  ;;  %v74_v44 = vrot.slane %v5358_v37, 1  ;;  %v4963_v10 = vld [vmem:[%s6584_s1 + $0x138] sm:$0xff]  }
   0xe   :  { %4511 = vmatprep.subr.bf16.mxu1 %v4943_v13  ;;  %v5356_v36 = vpack.c.bf16 %v28_v33, %v27_v32  ;;  %v4965_v12 = vld [vmem:[%s6584_s1 + $0x1b8] sm:$0xff]   ;;  %v4974_v32 = vld [vmem:[%s6584_s1 + $0x160] sm:$0xff]   ;;  %v32_v34 = vld [vmem:[%s6585_s0 + $0x28] sm:$0xff] }
   0xf   :  { %v50_v49 = vrot.slane %v5371_v42, 1  ;;  %v83_v50 = vrot.slane %v5374_v43, 1  ;;  %v84_v51 = vrot.slane %v5371_v42, 2  ;;  %v459_v53 = vshll.u32 %v5374_v43, 16  ;;  %v31_v33 = vld [vmem:[%s6585_s0 + $0x20] sm:$0xff] }
  0x10   :  { %4484 = vmatpush3.bf16.msra.mxu0 %v4944_v14  ;;  %v5364_v39 = vshrl.u32 %v5356_v36, 16  ;;  %v5367_v40 = vshll.u32 %v5356_v36, 16  ;;  %v73_v41 = vrot.slane %v5356_v36, 1  ;;  %v471_v58 = vshll.u32 %v74_v44, 16  ;;  %v4966_v14 = vld [vmem:[%s6584_s1 + $0x170] sm:$0xff]   ;;  %v4976_v35 = vld [vmem:[%s6584_s1 + $0x1e0] sm:$0xff]  }
  0x11   :  { %4512 = vmatpush3.bf16.msra.mxu1 %v4945_v15  ;;  %4485 = vmatprep.subr.bf16.mxu0 %v4946_v16  ;;  %v85_v56 = vor.u32 %v84_v51, %v83_v50  ;;  %v483_v57 = vshll.u32 %v83_v50, 16  ;;  %v461_v1 = vrot.slane %v459_v53, 1  ;;  %v96_v53 = vrot.slane %v5358_v37, 2 }
  0x12   :  { %4513 = vmatprep.subr.bf16.mxu1 %v4947_v17  ;;  %v45_v46 = vrot.slane %v5367_v40, 1  ;;  %v80_v47 = vrot.slane %v5364_v39, 1  ;;  %v81_v48 = vrot.slane %v5367_v40, 2  ;;  %v75_v55 = vsel %vm72_vm2, %v73_v41, %v74_v44  ;;  %v34_v41 = vld [vmem:[%s6585_s0 + $0x38] sm:$0xff] }
  0x13   :  { %v464_v60 = vshrl.u32 %v75_v55, 16  ;;  %v466_v61 = vshll.u32 %v75_v55, 16  ;;  %v473_v6 = vrot.slane %v471_v58, 1  ;;  %v485_v8 = vrot.slane %v483_v57, 1  ;;  %v4978_v55 = vld [vmem:[%s6584_s1 + $0x158] sm:$0xff]  }
  0x14   :  { %4486 = vmatpush3.bf16.msra.mxu0 %v4948_v18  ;;  %v46_v52 = vor.u32 %v45_v46, %v5364_v39  ;;  %v82_v54 = vor.u32 %v81_v48, %v80_v47  ;;  %v102_v17 = vrot.slane %v5364_v39, 2  ;;  %v103_v18 = vrot.slane %v5367_v40, 3 }
  0x15   :  { %4514 = vmatpush3.bf16.msra.mxu1 %v4949_v19  ;;  %4487 = vmatprep.subr.bf16.mxu0 %v4950_v20  ;;  %v468_v4 = vrot.slane %v466_v61, 1  ;;  %v4968_v20 = vld [vmem:[%s6584_s1 + $0x1f0] sm:$0xff]   ;;  %v5448_v44 = vpack.c.bf16 %v32_v34, %v31_v33  ;;  %v95_v48 = vrot.slane %v5356_v36, 2  ;;  %v4986_v33 = vld [vmem:[%s6584_s1 + $0x148] sm:$0xff]  }
  0x16   :  { %4515 = vmatprep.subr.bf16.mxu1 %v4951_v21  ;;  %v51_v59 = vsel %vm39_vm0, %v46_v52, %v50_v49  ;;  %v86_v0 = vsel %vm79_vm1, %v82_v54, %v85_v56  ;;  %v105_v21 = vrot.slane %v5374_v43, 2  ;;  %v4975_v49 = vld [vmem:[%s6584_s1 + $0x120] sm:$0xff]  }
  0x17   :  { %v452_v62 = vshrl.u32 %v51_v59, 16  ;;  %v454_v63 = vshll.u32 %v51_v59, 16  ;;  %v476_v2 = vshrl.u32 %v86_v0, 16  ;;  %v478_v3 = vshll.u32 %v86_v0, 16  ;;  %v4977_v54 = vld [vmem:[%s6584_s1 + $0x1a0] sm:$0xff]  }
  0x18   :  { %4488 = vmatpush3.bf16.msra.mxu0 %v4952_v22  ;;  %v469_v9 = vor.u32 %v468_v4, %v464_v60  ;;  %v4967_v22 = vld [vmem:[%s6584_s1 + $0x130] sm:$0xff]   ;;  %v5461_v50 = vshrl.u32 %v5448_v44, 16  ;;  %v5464_v51 = vshll.u32 %v5448_v44, 16  ;;  %v76_v52 = vrot.slane %v5448_v44, 1  ;;  %v4979_v4 = vld [vmem:[%s6584_s1 + $0x118] sm:$0xff]  }
  0x19   :  { %4516 = vmatpush3.bf16.msra.mxu1 %v4953_v23  ;;  %4489 = vmatprep.subr.bf16.mxu0 %v4954_v24  ;;  %v456_v5 = vrot.slane %v454_v63, 1  ;;  %v480_v7 = vrot.slane %v478_v3, 1  ;;  %v106_v23 = vrot.slane %v5371_v42, 3  ;;  %v4969_v24 = vld [vmem:[%s6584_s1 + $0x1b0] sm:$0xff]  }
  0x1a   :  { %4517 = vmatprep.subr.bf16.mxu1 %v4955_v25  ;;  %v474_v16 = vsel %vm39_vm0, %v469_v9, %v473_v6  ;;  %v4970_v25 = vld [vmem:[%s6584_s1 + $0x168] sm:$0xff]   ;;  %v59_v60 = vrot.slane %v5464_v51, 1  ;;  %v87_v61 = vrot.slane %v5461_v50, 1 }
  0x1b   :  { %v457_v11 = vor.u32 %v456_v5, %v452_v62  ;;  %v481_v13 = vor.u32 %v480_v7, %v476_v2  ;;  %v88_v62 = vrot.slane %v5464_v51, 2  ;;  %v4980_v7 = vld [vmem:[%s6584_s1 + $0x1d8] sm:$0xff]  }
  0x1c   :  { %4490 = vmatpush3.bf16.msra.mxu0 %v4956_v26  ;;  %v104_v26 = vor.u32 %v103_v18, %v102_v17  ;;  %v60_v5 = vor.u32 %v59_v60, %v5461_v50 }
  0x1d   :  { %4518 = vmatpush3.bf16.msra.mxu1 %v4957_v27  ;;  %4491 = vmatprep.subr.bf16.mxu0 %v4958_v28  ;;  %v462_v15 = vsel %vm39_vm0, %v457_v11, %v461_v1  ;;  %v486_v19 = vsel %vm39_vm0, %v481_v13, %v485_v8  ;;  %v107_v27 = vor.u32 %v106_v23, %v105_v21  ;;  %v5419_v28 = vshll.u32 %v105_v21, 16  ;;  %v4982_v13 = vld [vmem:[%s6584_s1 + $0x150] sm:$0xff]  }
  0x1e   :  { %4519 = vmatprep.subr.bf16.mxu1 %v4959_v29  ;;  %1569 = vmatprep.mubr.bf16.mxu0 %v462_v15  ;;  %v4971_v29 = vld [vmem:[%s6584_s1 + $0x128] sm:$0xff]   ;;  %v89_v6 = vor.u32 %v88_v62, %v87_v61  ;;  %v4990_v62 = vld [vmem:[%s6584_s1 + $0x140] sm:$0xff]  }
  0x1f   :  { %1618 = vmatprep.mubr.bf16.mxu1 %v486_v19  ;;  %v5453_v46 = vsel %vm101_vm3, %v104_v26, %v107_v27  ;;  %v509_v47 = vrot.slane %v5419_v28, 1  ;;  %v4983_v27 = vld [vmem:[%s6584_s1 + $0x110] sm:$0xff]   ;;  %v4992_v28 = vld [vmem:[%s6584_s1 + $0x1c0] sm:$0xff]  }
  0x20   :  { %4492 = vmatpush3.bf16.msra.mxu0 %v4960_v30  ;;  %v4972_v30 = vld [vmem:[%s6584_s1 + $0x1e8] sm:$0xff]   ;;  %v502_v63 = vshll.u32 %v5453_v46, 16 }
  0x21   :  { %4520 = vmatpush3.bf16.msra.mxu1 %v4961_v31  ;;  %4533 = vmatprep.subr.bf16.mxu0 %v4962_v38  ;;  %v4973_v31 = vld [vmem:[%s6584_s1 + $0x1a8] sm:$0xff]   ;;  %v33_v38 = vld [vmem:[%s6585_s0 + $0x30] sm:$0xff] }
  0x22   :  { %4561 = vmatprep.subr.bf16.mxu1 %v4964_v45  ;;  %v5450_v45 = vpack.c.bf16 %v34_v41, %v33_v38  ;;  %v97_v38 = vsel %vm94_vm4, %v95_v48, %v96_v53 }
  0x23   :  { %1570 = vmatmul.mubr.bf16.vlgmr.msra.gmra.mxu0 %v51_v59  ;;  %v500_v59 = vshrl.u32 %v5453_v46, 16  ;;  %v490_v61 = vshll.u32 %v97_v38, 16 }
  0x24   :  { %1619 = vmatmul.mubr.bf16.vlgmr.msra.gmra.mxu1 %v474_v16  ;;  %4534 = vmatpush3.bf16.msra.mxu0 %v4963_v10  ;;  %v5475_v56 = vshll.u32 %v5450_v45, 16  ;;  %v5478_v57 = vshrl.u32 %v5450_v45, 16  ;;  %v77_v58 = vrot.slane %v5450_v45, 1 }
  0x25   :  { %4562 = vmatpush3.bf16.msra.mxu1 %v4965_v12  ;;  %4535 = vmatprep.subr.bf16.mxu0 %v4966_v14  ;;  %v4981_v12 = vld [vmem:[%s6584_s1 + $0x198] sm:$0xff]   ;;  %v5504_v14 = vshll.u32 %v96_v53, 16  ;;  %v488_v53 = vshrl.u32 %v97_v38, 16  ;;  %v98_v38 = vrot.slane %v5448_v44, 2 }
  0x26   :  { %4563 = vmatprep.subr.bf16.mxu1 %v4968_v20  ;;  %v64_v0 = vrot.slane %v5475_v56, 1  ;;  %v627_v1 = vshll.u32 %v5478_v57, 16  ;;  %v90_v2 = vrot.slane %v5478_v57, 1  ;;  %v91_v3 = vrot.slane %v5475_v56, 2 }
  0x27   :  { %v78_v8 = vsel %vm72_vm2, %v76_v52, %v77_v58  ;;  %v639_v9 = vshll.u32 %v77_v58, 16  ;;  %v504_v52 = vrot.slane %v502_v63, 1  ;;  %v4988_v58 = vld [vmem:[%s6584_s1 + $0x1c8] sm:$0xff]   ;;  %v497_v63 = vrot.slane %v5504_v14, 1 }
  0x28   :  { %4536 = vmatpush3.bf16.msra.mxu0 %v4967_v22  ;;  %v92_v10 = vor.u32 %v91_v3, %v90_v2  ;;  %v651_v11 = vshll.u32 %v90_v2, 16  ;;  %v65_v15 = vsel %vm39_vm0, %v60_v5, %v64_v0  ;;  %v632_v16 = vshrl.u32 %v78_v8, 16  ;;  %v4984_v22 = vld [vmem:[%s6584_s1 + $0x1d0] sm:$0xff]   ;;  %v4989_v0 = vld [vmem:[%s6584_s1 + $0x188] sm:$0xff]   ;;  %v4991_v5 = vld [vmem:[%s6584_s1 + $0x100] sm:$0xff]  }
  0x29   :  { %4564 = vmatpush3.bf16.msra.mxu1 %v4969_v24  ;;  %4537 = vmatprep.subr.bf16.mxu0 %v4970_v25  ;;  %v634_v17 = vshll.u32 %v78_v8, 16  ;;  %v620_v18 = vshrl.u32 %v65_v15, 16  ;;  %v622_v19 = vshll.u32 %v65_v15, 16  ;;  %v629_v20 = vrot.slane %v627_v1, 1 }
  0x2a   :  { %4565 = vmatprep.subr.bf16.mxu1 %v4972_v30  ;;  %v93_v21 = vsel %vm79_vm1, %v89_v6, %v92_v10  ;;  %v641_v26 = vrot.slane %v639_v9, 1  ;;  %v653_v30 = vrot.slane %v651_v11, 1  ;;  %v505_v48 = vor.u32 %v504_v52, %v500_v59  ;;  %v4993_v9 = vld [vmem:[%s6584_s1 + $0x180] sm:$0xff]   ;;  %v4994_v10 = vld [vmem:[%s6584_s1 + $0x278] sm:$0xff]  }
  0x2b   :  { %v644_v23 = vshrl.u32 %v93_v21, 16  ;;  %v646_v24 = vshll.u32 %v93_v21, 16  ;;  %v636_v25 = vrot.slane %v634_v17, 1  ;;  %v492_v59 = vrot.slane %v490_v61, 1  ;;  %v4998_v21 = vld [vmem:[%s6584_s1 + $0x270] sm:$0xff]  }
  0x2c   :  { %4538 = vmatpush3.bf16.msra.mxu0 %v4971_v29  ;;  %v624_v29 = vrot.slane %v622_v19, 1  ;;  %v510_v46 = vsel %vm39_vm0, %v505_v48, %v509_v47  ;;  %v124_v1 = vrot.slane %v5364_v39, 3  ;;  %v125_v2 = vrot.slane %v5367_v40, 4  ;;  %v5002_v48 = vld [vmem:[%s6584_s1 + $0x268] sm:$0xff]  }
  0x2d   :  { %4566 = vmatpush3.bf16.msra.mxu1 %v4973_v31  ;;  %4539 = vmatprep.subr.bf16.mxu0 %v4974_v32  ;;  %v648_v31 = vrot.slane %v646_v24, 1  ;;  %v637_v32 = vor.u32 %v636_v25, %v632_v16  ;;  %v127_v3 = vrot.slane %v5374_v43, 3  ;;  %v493_v47 = vor.u32 %v492_v59, %v488_v53 }
  0x2e   :  { %4567 = vmatprep.subr.bf16.mxu1 %v4976_v35  ;;  %v625_v34 = vor.u32 %v624_v29, %v620_v18  ;;  %v4985_v35 = vld [vmem:[%s6584_s1 + $0x190] sm:$0xff]   ;;  %v126_v6 = vor.u32 %v125_v2, %v124_v1  ;;  %v118_v8 = vrot.slane %v5358_v37, 3  ;;  %v131_v53 = vrot.slane %v5461_v50, 3 }
  0x2f   :  { %v649_v41 = vor.u32 %v648_v31, %v644_v23  ;;  %v498_v16 = vsel %vm39_vm0, %v493_v47, %v497_v63  ;;  %v112_v31 = vrot.slane %v5478_v57, 2  ;;  %v132_v61 = vrot.slane %v5464_v51, 4  ;;  %v5001_v2 = vld [vmem:[%s6584_s1 + $0x2b0] sm:$0xff]  }
  0x30   :  { %4540 = vmatpush3.bf16.msra.mxu0 %v4975_v49  ;;  %v4987_v49 = vld [vmem:[%s6584_s1 + $0x108] sm:$0xff]  }
  0x31   :  { %4568 = vmatpush3.bf16.msra.mxu1 %v4977_v54  ;;  %4541 = vmatprep.subr.bf16.mxu0 %v4978_v55  ;;  %v630_v54 = vsel %vm39_vm0, %v625_v34, %v629_v20  ;;  %v642_v55 = vsel %vm39_vm0, %v637_v32, %v641_v26  ;;  %v654_v60 = vsel %vm39_vm0, %v649_v41, %v653_v30  ;;  %v4996_v20 = vld [vmem:[%s6584_s1 + $0x2f8] sm:$0xff]   ;;  %v110_v30 = vrot.slane %v5464_v51, 3 }
  0x32   :  { %4569 = vmatprep.subr.bf16.mxu1 %v4980_v7  ;;  %1577 = vmatprep.mubr.bf16.mxu0 %v630_v54  ;;  %v117_v7 = vrot.slane %v5356_v36, 3  ;;  %v113_v32 = vrot.slane %v5475_v56, 3  ;;  %v4997_v34 = vld [vmem:[%s6584_s1 + $0x2b8] sm:$0xff]  }
  0x33   :  { %1626 = vmatprep.mubr.bf16.mxu1 %v654_v60  ;;  %1578 = vmatmul.mubr.bf16.gmra.mxu0 %v65_v15  ;;  %v519_v15 = vshll.u32 %v118_v8, 16  ;;  %v99_v60 = vrot.slane %v5450_v45, 2 }
  0x34   :  { %4542 = vmatpush3.bf16.msra.mxu0 %v4979_v4  ;;  %1627 = vmatmul.mubr.bf16.gmra.mxu1 %v642_v55  ;;  %v128_v4 = vrot.slane %v5371_v42, 4  ;;  %v119_v14 = vsel %vm116_vm6, %v117_v7, %v118_v8  ;;  %v114_v54 = vor.u32 %v113_v32, %v112_v31  ;;  %v675_v55 = vshll.u32 %v112_v31, 16  ;;  %v5004_v8 = vld [vmem:[%s6584_s1 + $0x2e8] sm:$0xff]   ;;  %v5008_v32 = vld [vmem:[%s6584_s1 + $0x2e0] sm:$0xff]  }
  0x35   :  { %4570 = vmatpush3.bf16.msra.mxu1 %v4981_v12  ;;  %4543 = vmatprep.subr.bf16.mxu0 %v4982_v13  ;;  %v531_v12 = vshll.u32 %v127_v3, 16  ;;  %v4995_v13 = vld [vmem:[%s6584_s1 + $0x238] sm:$0xff]   ;;  %v512_v18 = vshrl.u32 %v119_v14, 16  ;;  %v514_v19 = vshll.u32 %v119_v14, 16  ;;  %v521_v25 = vrot.slane %v519_v15, 1 }
  0x36   :  { %4571 = vmatprep.subr.bf16.mxu1 %v4984_v22  ;;  %1667 = vmatprep.mubr.bf16.mxu0 %v510_v46  ;;  %v129_v11 = vor.u32 %v128_v4, %v127_v3  ;;  %v134_v46 = vrot.slane %v5478_v57, 3  ;;  %v100_v3 = vsel %vm94_vm4, %v98_v38, %v99_v60  ;;  %v663_v4 = vshll.u32 %v99_v60, 16  ;;  %v5014_v60 = vld [vmem:[%s6584_s1 + $0x250] sm:$0xff]  }
  0x37   :  { %v533_v24 = vrot.slane %v531_v12, 1  ;;  %v516_v26 = vrot.slane %v514_v19, 1  ;;  %v658_v47 = vshll.u32 %v100_v3, 16  ;;  %v135_v7 = vrot.slane %v5475_v56, 4 }
  0x38   :  { %4544 = vmatpush3.bf16.msra.mxu0 %v4983_v27  ;;  %v130_v17 = vsel %vm123_vm5, %v126_v6, %v129_v11  ;;  %v109_v27 = vrot.slane %v5461_v50, 2  ;;  %v133_v6 = vor.u32 %v132_v61, %v131_v53  ;;  %v699_v11 = vshll.u32 %v134_v46, 16  ;;  %v5013_v61 = vld [vmem:[%s6584_s1 + $0x298] sm:$0xff]  }
  0x39   :  { %4545 = vmatprep.subr.bf16.mxu0 %v4986_v33  ;;  %4572 = vmatpush3.bf16.msra.mxu1 %v4985_v35  ;;  %v524_v22 = vshrl.u32 %v130_v17, 16  ;;  %v526_v23 = vshll.u32 %v130_v17, 16  ;;  %v517_v33 = vor.u32 %v516_v26, %v512_v18  ;;  %v4999_v35 = vld [vmem:[%s6584_s1 + $0x230] sm:$0xff]   ;;  %v120_v12 = vrot.slane %v5448_v44, 3  ;;  %v5006_v17 = vld [vmem:[%s6584_s1 + $0x260] sm:$0xff]  }
  0x3a   :  { %4573 = vmatprep.subr.bf16.mxu1 %v4988_v58  ;;  %v111_v52 = vor.u32 %v110_v30, %v109_v27  ;;  %v136_v14 = vor.u32 %v135_v7, %v134_v46  ;;  %v121_v15 = vrot.slane %v5450_v45, 3  ;;  %v701_v26 = vrot.slane %v699_v11, 1  ;;  %v5005_v27 = vld [vmem:[%s6584_s1 + $0x2a8] sm:$0xff]  }
  0x3b   :  { %v528_v29 = vrot.slane %v526_v23, 1  ;;  %v522_v58 = vsel %vm39_vm0, %v517_v33, %v521_v25  ;;  %v5010_v33 = vld [vmem:[%s6584_s1 + $0x258] sm:$0xff]   ;;  %v147_v46 = vrot.slane %v5367_v40, 5 }
  0x3c   :  { %4546 = vmatpush3.bf16.msra.mxu0 %v4987_v49  ;;  %v5000_v49 = vld [vmem:[%s6584_s1 + $0x2f0] sm:$0xff]   ;;  %v115_v63 = vsel %vm101_vm3, %v111_v52, %v114_v54  ;;  %v137_v19 = vsel %vm123_vm5, %v133_v6, %v136_v14  ;;  %v168_v14 = vrot.slane %v5364_v39, 5 }
  0x3d   :  { %4547 = vmatprep.subr.bf16.mxu0 %v4990_v62  ;;  %4574 = vmatpush3.bf16.msra.mxu1 %v4989_v0  ;;  %v529_v41 = vor.u32 %v528_v29, %v524_v22  ;;  %v677_v0 = vrot.slane %v675_v55, 1  ;;  %v668_v59 = vshrl.u32 %v115_v63, 16  ;;  %v670_v1 = vshll.u32 %v115_v63, 16  ;;  %v5007_v22 = vld [vmem:[%s6584_s1 + $0x220] sm:$0xff]   ;;  %v5012_v55 = vld [vmem:[%s6584_s1 + $0x2d8] sm:$0xff]  }
  0x3e   :  { %4575 = vmatprep.subr.bf16.mxu1 %v4992_v28  ;;  %v656_v28 = vshrl.u32 %v100_v3, 16  ;;  %v694_v25 = vshll.u32 %v137_v19, 16  ;;  %v149_v63 = vrot.slane %v5374_v43, 4  ;;  %v139_v3 = vrot.slane %v5356_v36, 4 }
  0x3f   :  { %v534_v62 = vsel %vm39_vm0, %v529_v41, %v533_v24  ;;  %v692_v24 = vshrl.u32 %v137_v19, 16  ;;  %v5009_v41 = vld [vmem:[%s6584_s1 + $0x2a0] sm:$0xff]  }
  0x40   :  { %4548 = vmatpush3.bf16.msra.mxu0 %v4991_v5  ;;  %1716 = vmatprep.mubr.bf16.mxu1 %v534_v62  ;;  %v5003_v5 = vld [vmem:[%s6584_s1 + $0x228] sm:$0xff]   ;;  %v5015_v62 = vld [vmem:[%s6584_s1 + $0x210] sm:$0xff]  }
  0x41   :  { %4589 = vmatprep.subr.bf16.mxu0 %v4994_v10  ;;  %4576 = vmatpush3.bf16.msra.mxu1 %v4993_v9  ;;  %v672_v9 = vrot.slane %v670_v1, 1  ;;  %v665_v10 = vrot.slane %v663_v4, 1  ;;  %v555_v1 = vshll.u32 %v149_v63, 16  ;;  %v5019_v4 = vld [vmem:[%s6584_s1 + $0x208] sm:$0xff]  }
  0x42   :  { %4617 = vmatprep.subr.bf16.mxu1 %v4996_v20  ;;  %v122_v20 = vsel %vm116_vm6, %v120_v12, %v121_v15  ;;  %v5021_v12 = vld [vmem:[%s6584_s1 + $0x288] sm:$0xff]  }
  0x43   :  { %1668 = vmatmul.mubr.bf16.vlgmr.msra.gmra.mxu0 %v498_v16  ;;  %v673_v16 = vor.u32 %v672_v9, %v668_v59  ;;  %v680_v30 = vshrl.u32 %v122_v20, 16  ;;  %v682_v31 = vshll.u32 %v122_v20, 16  ;;  %v150_v59 = vrot.slane %v5371_v42, 5  ;;  %v5022_v9 = vld [vmem:[%s6584_s1 + $0x240] sm:$0xff]  }
  0x44   :  { %4590 = vmatpush3.bf16.msra.mxu0 %v4995_v13  ;;  %1717 = vmatmul.mubr.bf16.vlgmr.msra.gmra.mxu1 %v522_v58  ;;  %v660_v13 = vrot.slane %v658_v47, 1  ;;  %v5020_v47 = vld [vmem:[%s6584_s1 + $0x2c8] sm:$0xff]  }
  0x45   :  { %4591 = vmatprep.subr.bf16.mxu0 %v4998_v21  ;;  %4618 = vmatpush3.bf16.msra.mxu1 %v4997_v34  ;;  %v687_v21 = vshll.u32 %v121_v15, 16  ;;  %v678_v23 = vsel %vm39_vm0, %v673_v16, %v677_v0  ;;  %v696_v34 = vrot.slane %v694_v25, 1  ;;  %v684_v38 = vrot.slane %v682_v31, 1  ;;  %v5016_v0 = vld [vmem:[%s6584_s1 + $0x2d0] sm:$0xff]   ;;  %v5024_v15 = vld [vmem:[%s6584_s1 + $0x2c0] sm:$0xff]  }
  0x46   :  { %4619 = vmatprep.subr.bf16.mxu1 %v5000_v49  ;;  %v661_v18 = vor.u32 %v660_v13, %v656_v28  ;;  %1675 = vmatprep.mubr.bf16.mxu0 %v678_v23  ;;  %v5011_v49 = vld [vmem:[%s6584_s1 + $0x218] sm:$0xff]   ;;  %v140_v28 = vrot.slane %v5358_v37, 4  ;;  %v151_v7 = vor.u32 %v150_v59, %v149_v63  ;;  %v5023_v13 = vld [vmem:[%s6584_s1 + $0x200] sm:$0xff]   ;;  %v171_v25 = vrot.slane %v5374_v43, 5 }
  0x47   :  { %v697_v52 = vor.u32 %v696_v34, %v692_v24  ;;  %v685_v54 = vor.u32 %v684_v38, %v680_v30  ;;  %v5026_v23 = vld [vmem:[%s6584_s1 + $0x378] sm:$0xff]   ;;  %v169_v24 = vrot.slane %v5367_v40, 6  ;;  %v162_v38 = vrot.slane %v5358_v37, 5 }
  0x48   :  { %4592 = vmatpush3.bf16.msra.mxu0 %v4999_v35  ;;  %v666_v29 = vsel %vm39_vm0, %v661_v18, %v665_v10  ;;  %v689_v35 = vrot.slane %v687_v21, 1  ;;  %v141_v10 = vsel %vm138_vm7, %v139_v3, %v140_v28  ;;  %v543_v11 = vshll.u32 %v140_v28, 16 }
  0x49   :  { %4593 = vmatprep.subr.bf16.mxu0 %v5002_v48  ;;  %4620 = vmatpush3.bf16.msra.mxu1 %v5001_v2  ;;  %v702_v58 = vsel %vm39_vm0, %v697_v52, %v701_v26  ;;  %v146_v48 = vrot.slane %v5364_v39, 4  ;;  %v5018_v2 = vld [vmem:[%s6584_s1 + $0x248] sm:$0xff]   ;;  %v536_v16 = vshrl.u32 %v141_v10, 16  ;;  %v538_v18 = vshll.u32 %v141_v10, 16 }
  0x4a   :  { %4621 = vmatprep.subr.bf16.mxu1 %v5004_v8  ;;  %1724 = vmatprep.mubr.bf16.mxu1 %v702_v58  ;;  %v690_v53 = vsel %vm39_vm0, %v685_v54, %v689_v35  ;;  %v557_v8 = vrot.slane %v555_v1, 1  ;;  %v545_v19 = vrot.slane %v543_v11, 1  ;;  %v170_v31 = vor.u32 %v169_v24, %v168_v14  ;;  %v5027_v54 = vld [vmem:[%s6584_s1 + $0x338] sm:$0xff]  }
  0x4b   :  { %1676 = vmatmul.mubr.bf16.gmra.mxu0 %v666_v29  ;;  %v148_v6 = vor.u32 %v147_v46, %v146_v48  ;;  %v5025_v29 = vld [vmem:[%s6584_s1 + $0x280] sm:$0xff]   ;;  %v567_v48 = vshll.u32 %v162_v38, 16  ;;  %v5030_v46 = vld [vmem:[%s6584_s1 + $0x330] sm:$0xff]   ;;  %v153_v1 = vrot.slane %v5461_v50, 4  ;;  %v156_v3 = vrot.slane %v5478_v57, 4 }
  0x4c   :  { %4594 = vmatpush3.bf16.msra.mxu0 %v5003_v5  ;;  %1725 = vmatmul.mubr.bf16.gmra.mxu1 %v690_v53  ;;  %v5017_v5 = vld [vmem:[%s6584_s1 + $0x290] sm:$0xff]   ;;  %v157_v28 = vrot.slane %v5475_v56, 5  ;;  %v175_v10 = vrot.slane %v5461_v50, 5  ;;  %v176_v14 = vrot.slane %v5464_v51, 6 }
  0x4d   :  { %4595 = vmatprep.subr.bf16.mxu0 %v5006_v17  ;;  %4622 = vmatpush3.bf16.msra.mxu1 %v5005_v27  ;;  %v152_v17 = vsel %vm145_vm9, %v148_v6, %v151_v7  ;;  %v172_v27 = vrot.slane %v5371_v42, 6  ;;  %v5029_v53 = vld [vmem:[%s6584_s1 + $0x370] sm:$0xff]   ;;  %v569_v59 = vrot.slane %v567_v48, 1  ;;  %v723_v7 = vshll.u32 %v156_v3, 16 }
  0x4e   :  { %4623 = vmatprep.subr.bf16.mxu1 %v5008_v32  ;;  %v548_v20 = vshrl.u32 %v152_v17, 16  ;;  %v550_v21 = vshll.u32 %v152_v17, 16  ;;  %v579_v32 = vshll.u32 %v171_v25, 16 }
  0x4f   :  { %v173_v35 = vor.u32 %v172_v27, %v171_v25  ;;  %v5035_v27 = vld [vmem:[%s6584_s1 + $0x360] sm:$0xff]  }
  0x50   :  { %4596 = vmatpush3.bf16.msra.mxu0 %v5007_v22  ;;  %v540_v22 = vrot.slane %v538_v18, 1  ;;  %v552_v26 = vrot.slane %v550_v21, 1  ;;  %v581_v52 = vrot.slane %v579_v32, 1  ;;  %v178_v18 = vrot.slane %v5478_v57, 5 }
  0x51   :  { %4597 = vmatprep.subr.bf16.mxu0 %v5010_v33  ;;  %4624 = vmatpush3.bf16.msra.mxu1 %v5009_v41  ;;  %v161_v33 = vrot.slane %v5356_v36, 5  ;;  %v5028_v41 = vld [vmem:[%s6584_s1 + $0x3b8] sm:$0xff]   ;;  %v174_v58 = vsel %vm167_vm10, %v170_v31, %v173_v35  ;;  %v179_v31 = vrot.slane %v5475_v56, 6  ;;  %v164_v32 = vrot.slane %v5448_v44, 5 }
  0x52   :  { %4625 = vmatprep.subr.bf16.mxu1 %v5012_v55  ;;  %v541_v30 = vor.u32 %v540_v22, %v536_v16  ;;  %v553_v34 = vor.u32 %v552_v26, %v548_v20 }
  0x54   :  { %4598 = vmatpush3.bf16.msra.mxu0 %v5011_v49  ;;  %v546_v49 = vsel %vm39_vm0, %v541_v30, %v545_v19  ;;  %v558_v55 = vsel %vm39_vm0, %v553_v34, %v557_v8  ;;  %v143_v8 = vrot.slane %v5450_v45, 4  ;;  %v177_v30 = vor.u32 %v176_v14, %v175_v10 }
  0x55   :  { %4599 = vmatprep.subr.bf16.mxu0 %v5014_v60  ;;  %4626 = vmatpush3.bf16.msra.mxu1 %v5013_v61  ;;  %v163_v60 = vsel %vm160_vm8, %v161_v33, %v162_v38  ;;  %v572_v61 = vshrl.u32 %v174_v58, 16  ;;  %v165_v38 = vrot.slane %v5450_v45, 5  ;;  %v191_v10 = vrot.slane %v5367_v40, 7 }
  0x56   :  { %4627 = vmatprep.subr.bf16.mxu1 %v5016_v0  ;;  %1765 = vmatprep.mubr.bf16.mxu0 %v558_v55  ;;  %v560_v63 = vshrl.u32 %v163_v60, 16  ;;  %v562_v0 = vshll.u32 %v163_v60, 16  ;;  %v711_v17 = vshll.u32 %v143_v8, 16  ;;  %v194_v14 = vrot.slane %v5371_v42, 7  ;;  %v5043_v42 = vld [vmem:[%s6584_s1 + $0x390] sm:$0xff]  }
  0x57   :  { %v166_v60 = vsel %vm160_vm8, %v164_v32, %v165_v38  ;;  %v735_v48 = vshll.u32 %v165_v38, 16 }
  0x58   :  { %4600 = vmatpush3.bf16.msra.mxu0 %v5015_v62  ;;  %v574_v62 = vshll.u32 %v174_v58, 16  ;;  %v713_v35 = vrot.slane %v711_v17, 1 }
  0x59   :  { %4601 = vmatprep.subr.bf16.mxu0 %v5018_v2  ;;  %4628 = vmatpush3.bf16.msra.mxu1 %v5017_v5  ;;  %v154_v2 = vrot.slane %v5464_v51, 5  ;;  %v564_v5 = vrot.slane %v562_v0, 1 }
  0x5a   :  { %4629 = vmatprep.subr.bf16.mxu1 %v5020_v47  ;;  %v142_v47 = vrot.slane %v5448_v44, 4 }
  0x5b   :  { %v155_v6 = vor.u32 %v154_v2, %v153_v1  ;;  %v5037_v1 = vld [vmem:[%s6584_s1 + $0x3a0] sm:$0xff]   ;;  %v5038_v2 = vld [vmem:[%s6584_s1 + $0x358] sm:$0xff]  }
  0x5c   :  { %4602 = vmatpush3.bf16.msra.mxu0 %v5019_v4  ;;  %v576_v4 = vrot.slane %v574_v62, 1  ;;  %v144_v16 = vsel %vm138_vm7, %v142_v47, %v143_v8  ;;  %v730_v62 = vshll.u32 %v166_v60, 16 }
  0x5d   :  { %4603 = vmatprep.subr.bf16.mxu0 %v5022_v9  ;;  %4630 = vmatpush3.bf16.msra.mxu1 %v5021_v12  ;;  %v5032_v9 = vld [vmem:[%s6584_s1 + $0x368] sm:$0xff]   ;;  %v565_v12 = vor.u32 %v564_v5, %v560_v63  ;;  %v704_v22 = vshrl.u32 %v144_v16, 16  ;;  %v706_v26 = vshll.u32 %v144_v16, 16 }
  0x5e   :  { %4631 = vmatprep.subr.bf16.mxu1 %v5024_v15  ;;  %v577_v11 = vor.u32 %v576_v4, %v572_v61  ;;  %v5031_v15 = vld [vmem:[%s6584_s1 + $0x3b0] sm:$0xff]   ;;  %v728_v61 = vshrl.u32 %v166_v60, 16  ;;  %v737_v4 = vrot.slane %v735_v48, 1 }
  0x5f   :  { %v570_v20 = vsel %vm39_vm0, %v565_v12, %v569_v59  ;;  %v708_v34 = vrot.slane %v706_v26, 1  ;;  %v193_v12 = vrot.slane %v5374_v43, 6  ;;  %v5044_v43 = vld [vmem:[%s6584_s1 + $0x348] sm:$0xff]   ;;  %v209_v26 = vrot.slane %v5450_v45, 7 }
  0x60   :  { %4604 = vmatpush3.bf16.msra.mxu0 %v5023_v13  ;;  %v158_v13 = vor.u32 %v157_v28, %v156_v3  ;;  %v582_v19 = vsel %vm39_vm0, %v577_v11, %v581_v52  ;;  %v747_v52 = vshll.u32 %v178_v18, 16  ;;  %v732_v3 = vrot.slane %v730_v62, 1 }
  0x61   :  { %4645 = vmatprep.subr.bf16.mxu0 %v5026_v23  ;;  %4632 = vmatpush3.bf16.msra.mxu1 %v5025_v29  ;;  %v5033_v23 = vld [vmem:[%s6584_s1 + $0x328] sm:$0xff]   ;;  %v725_v29 = vrot.slane %v723_v7, 1  ;;  %v709_v58 = vor.u32 %v708_v34, %v704_v22  ;;  %v190_v7 = vrot.slane %v5364_v39, 6  ;;  %v5040_v39 = vld [vmem:[%s6584_s1 + $0x398] sm:$0xff]   ;;  %v603_v16 = vshll.u32 %v193_v12, 16 }
  0x62   :  { %4889 = vmatprep.subr.bf16.mxu1 %v5028_v41  ;;  %v159_v21 = vsel %vm145_vm9, %v155_v6, %v158_v13  ;;  %1814 = vmatprep.mubr.bf16.mxu1 %v582_v19  ;;  %v749_v28 = vrot.slane %v747_v52, 1  ;;  %v733_v47 = vor.u32 %v732_v3, %v728_v61  ;;  %v5039_v6 = vld [vmem:[%s6584_s1 + $0x318] sm:$0xff]   ;;  %v195_v17 = vor.u32 %v194_v14, %v193_v12  ;;  %v5045_v22 = vld [vmem:[%s6584_s1 + $0x308] sm:$0xff]  }
  0x63   :  { %1766 = vmatmul.mubr.bf16.vlgmr.msra.gmra.mxu0 %v546_v49  ;;  %v716_v24 = vshrl.u32 %v159_v21, 16  ;;  %v718_v25 = vshll.u32 %v159_v21, 16  ;;  %v180_v49 = vor.u32 %v179_v31, %v178_v18  ;;  %v714_v0 = vsel %vm39_vm0, %v709_v58, %v713_v35  ;;  %v5046_v35 = vld [vmem:[%s6584_s1 + $0x388] sm:$0xff]  }
  0x64   :  { %4646 = vmatpush3.bf16.msra.mxu0 %v5027_v54  ;;  %1815 = vmatmul.mubr.bf16.vlgmr.msra.gmra.mxu1 %v570_v20  ;;  %v5034_v54 = vld [vmem:[%s6584_s1 + $0x3a8] sm:$0xff]   ;;  %v738_v11 = vsel %vm39_vm0, %v733_v47, %v737_v4  ;;  %v192_v40 = vor.u32 %v191_v10, %v190_v7  ;;  %v183_v18 = vrot.slane %v5356_v36, 6  ;;  %v184_v19 = vrot.slane %v5358_v37, 6 }
  0x65   :  { %4647 = vmatprep.subr.bf16.mxu0 %v5029_v53  ;;  %4890 = vmatpush3.bf16.msra.mxu1 %v5028_v41  ;;  %v720_v33 = vrot.slane %v718_v25, 1  ;;  %v5036_v41 = vld [vmem:[%s6584_s1 + $0x320] sm:$0xff]   ;;  %v181_v53 = vsel %vm167_vm10, %v177_v30, %v180_v49  ;;  %v205_v20 = vrot.slane %v5356_v36, 7  ;;  %v206_v21 = vrot.slane %v5358_v37, 7 }
  0x66   :  { %4891 = vmatprep.subr.bf16.mxu1 %v5031_v15  ;;  %v742_v59 = vshll.u32 %v181_v53, 16  ;;  %v208_v25 = vrot.slane %v5448_v44, 7  ;;  %v185_v37 = vsel %vm182_vm11, %v183_v18, %v184_v19  ;;  %v591_v30 = vshll.u32 %v184_v19, 16 }
  0x67   :  { %v721_v55 = vor.u32 %v720_v33, %v716_v24  ;;  %v605_v24 = vrot.slane %v603_v16, 1  ;;  %v584_v31 = vshrl.u32 %v185_v37, 16  ;;  %v586_v32 = vshll.u32 %v185_v37, 16 }
  0x68   :  { %4648 = vmatpush3.bf16.msra.mxu0 %v5030_v46  ;;  %v740_v46 = vshrl.u32 %v181_v53, 16  ;;  %v744_v5 = vrot.slane %v742_v59, 1  ;;  %v207_v33 = vsel %vm204_vm12, %v205_v20, %v206_v21  ;;  %v615_v34 = vshll.u32 %v206_v21, 16 }
  0x69   :  { %4649 = vmatprep.subr.bf16.mxu0 %v5032_v9  ;;  %v726_v63 = vsel %vm39_vm0, %v721_v55, %v725_v29  ;;  %4892 = vmatpush3.bf16.msra.mxu1 %v5031_v15  ;;  %v5041_v9 = vld [vmem:[%s6584_s1 + $0x350] sm:$0xff]   ;;  %v608_v49 = vshrl.u32 %v207_v33, 16  ;;  %v610_v52 = vshll.u32 %v207_v33, 16  ;;  %v5048_v55 = vld [vmem:[%s6584_s1 + $0x300] sm:$0xff]   ;;  %v588_v58 = vrot.slane %v586_v32, 1 }
  0x6a   :  { %1773 = vmatprep.mubr.bf16.mxu0 %v726_v63  ;;  %4893 = vmatprep.subr.bf16.mxu1 %v5034_v54  ;;  %v745_v8 = vor.u32 %v744_v5, %v740_v46  ;;  %v5042_v15 = vld [vmem:[%s6584_s1 + $0x310] sm:$0xff]   ;;  %v593_v60 = vrot.slane %v591_v30, 1  ;;  %v617_v48 = vrot.slane %v615_v34, 1  ;;  %v783_v63 = vshll.u32 %v209_v26, 16 }
  0x6b   :  { %1774 = vmatmul.mubr.bf16.gmra.mxu0 %v714_v0  ;;  %v612_v61 = vrot.slane %v610_v52, 1  ;;  %v589_v0 = vor.u32 %v588_v58, %v584_v31  ;;  %v200_v59 = vrot.slane %v5478_v57, 6  ;;  %v201_v5 = vrot.slane %v5475_v56, 7  ;;  %v5051_v52 = vld [vmem:[%s6586_s4 + $0xf8] sm:$0xff]  }
  0x6c   :  { %4650 = vmatpush3.bf16.msra.mxu0 %v5033_v23  ;;  %v750_v13 = vsel %vm39_vm0, %v745_v8, %v749_v28  ;;  %v196_v23 = vsel %vm189_vm13, %v192_v40, %v195_v17  ;;  %v187_v8 = vrot.slane %v5450_v45, 6  ;;  %v785_v10 = vrot.slane %v783_v63, 1  ;;  %v5053_v58 = vld [vmem:[%s6586_s4 + $0xb8] sm:$0xff]   ;;  %v5057_v63 = vld [vmem:[%s6586_s4 + $0xb0] sm:$0xff]  }
  0x6d   :  { %4651 = vmatprep.subr.bf16.mxu0 %v5035_v27  ;;  %4894 = vmatpush3.bf16.msra.mxu1 %v5034_v54  ;;  %v5047_v27 = vld [vmem:[%s6584_s1 + $0x340] sm:$0xff]   ;;  %v596_v36 = vshrl.u32 %v196_v23, 16  ;;  %v598_v29 = vshll.u32 %v196_v23, 16  ;;  %v197_v54 = vrot.slane %v5461_v50, 6  ;;  %v198_v50 = vrot.slane %v5464_v51, 7 }
  0x6e   :  { %4895 = vmatprep.subr.bf16.mxu1 %v5037_v1  ;;  %1822 = vmatprep.mubr.bf16.mxu1 %v750_v13  ;;  %v613_v3 = vor.u32 %v612_v61, %v608_v49  ;;  %v594_v28 = vsel %vm39_vm0, %v589_v0, %v593_v60  ;;  %v186_v51 = vrot.slane %v5448_v44, 6  ;;  %v771_v7 = vshll.u32 %v200_v59, 16  ;;  %v5054_v60 = vld [vmem:[%s6586_s4 + $0x70] sm:$0xff]   ;;  %v5058_v0 = vld [vmem:[%s6586_s4 + $0x68] sm:$0xff]  }
  0x6f   :  { %1823 = vmatmul.mubr.bf16.gmra.mxu1 %v738_v11  ;;  %v600_v38 = vrot.slane %v598_v29, 1  ;;  %v199_v47 = vor.u32 %v198_v50, %v197_v54  ;;  %v759_v12 = vshll.u32 %v187_v8, 16  ;;  %v5052_v54 = vld [vmem:[%s6586_s4 + $0x38] sm:$0xff]   ;;  %v5056_v61 = vld [vmem:[%s6586_s4 + $0x30] sm:$0xff]   ;;  %v5059_v50 = vld [vmem:[%s6586_s4 + $0xe8] sm:$0xff]  }
  0x70   :  { %4652 = vmatpush3.bf16.msra.mxu0 %v5036_v41  ;;  %v210_v41 = vsel %vm204_vm12, %v208_v25, %v209_v26  ;;  %v618_v57 = vsel %vm39_vm0, %v613_v3, %v617_v48  ;;  %v188_v11 = vsel %vm182_vm11, %v186_v51, %v187_v8  ;;  %v5207_v48 = vmov 0   ;;  %v5062_v3 = vld [vmem:[%s6586_s4 + $0x60] sm:$0xff]   ;;  %v5068_v8 = vld [vmem:[%s6586_s4 + $0x18] sm:$0xff]  }
  0x71   :  { %4653 = vmatprep.subr.bf16.mxu0 %v5038_v2  ;;  %4896 = vmatpush3.bf16.msra.mxu1 %v5037_v1  ;;  %v601_v53 = vor.u32 %v600_v38, %v596_v36  ;;  %v778_v62 = vshll.u32 %v210_v41, 16  ;;  %v776_v46 = vshrl.u32 %v210_v41, 16  ;;  %v5049_v1 = vld [vmem:[%s6584_s1 + $0x380] sm:$0xff]   ;;  %v752_v44 = vshrl.u32 %v188_v11, 16  ;;  %1987 = vst [vmem:[#allocation2] sm:$0xf] %v5207_v48 }
  0x72   :  { %4897 = vmatprep.subr.bf16.mxu1 %v5040_v39  ;;  %4905 = vmatprep.mubr.bf16.mxu1 %v618_v57  ;;  %v754_v14 = vshll.u32 %v188_v11, 16  ;;  %1988 = vst [vmem:[#allocation2 + $0x10] sm:$0xf] %v5207_v48  ;;  %1989 = vst [vmem:[#allocation2 + $0xc] sm:$0xf] %v5207_v48  ;;  %v5065_v51 = vld [vmem:[%s6586_s4 + $0xa0] sm:$0xff]  }
  0x73   :  { %v606_v2 = vsel %vm39_vm0, %v601_v53, %v605_v24  ;;  %v780_v4 = vrot.slane %v778_v62, 1  ;;  %1990 = vst [vmem:[#allocation2 + $0x1c] sm:$0xf] %v5207_v48  ;;  %v5055_v53 = vld [vmem:[%s6586_s4 + $0xf0] sm:$0xff]   ;;  %v5066_v57 = vld [vmem:[%s6586_s4 + $0x58] sm:$0xff]  }
  0x74   :  { %4654 = vmatpush3.bf16.msra.mxu0 %v5039_v6  ;;  %1863 = vmatprep.mubr.bf16.mxu0 %v606_v2  ;;  %v202_v6 = vor.u32 %v201_v5, %v200_v59  ;;  %v756_v16 = vrot.slane %v754_v14, 1  ;;  %v5060_v59 = vld [vmem:[%s6586_s4 + $0x28] sm:$0xff]   ;;  %v5063_v5 = vld [vmem:[%s6586_s4 + $0xe0] sm:$0xff]   ;;  %v5087_v48 = vld [vmem:[%s6586_s4 + $0x1f8] sm:$0xff]  }
  0x75   :  { %4655 = vmatprep.subr.bf16.mxu0 %v5041_v9  ;;  %4898 = vmatpush3.bf16.msra.mxu1 %v5040_v39  ;;  %v781_v9 = vor.u32 %v780_v4, %v776_v46  ;;  %v5061_v2 = vld [vmem:[%s6586_s4 + $0xa8] sm:$0xff]  }
  0x76   :  { %4899 = vmatprep.subr.bf16.mxu1 %v5043_v42  ;;  %v203_v56 = vsel %vm189_vm13, %v199_v47, %v202_v6  ;;  %v757_v18 = vor.u32 %v756_v16, %v752_v44  ;;  %v5073_v44 = vld [vmem:[%s6586_s4 + $0x90] sm:$0xff]   ;;  %v5074_v14 = vld [vmem:[%s6586_s4 + $0x48] sm:$0xff]  }
  0x77   :  { %v764_v13 = vshrl.u32 %v203_v56, 16  ;;  %v766_v39 = vshll.u32 %v203_v56, 16  ;;  %v786_v40 = vsel %vm39_vm0, %v781_v9, %v785_v10  ;;  %v5069_v10 = vld [vmem:[%s6586_s4 + $0x98] sm:$0xff]   ;;  %v5070_v56 = vld [vmem:[%s6586_s4 + $0x50] sm:$0xff]  }
  0x78   :  { %4656 = vmatpush3.bf16.msra.mxu0 %v5042_v15  ;;  %v773_v15 = vrot.slane %v771_v7, 1  ;;  %v5067_v7 = vld [vmem:[%s6586_s4 + $0xd8] sm:$0xff]  }
  0x79   :  { %4657 = vmatprep.subr.bf16.mxu0 %v5044_v43  ;;  %4900 = vmatpush3.bf16.msra.mxu1 %v5043_v42  ;;  %v768_v45 = vrot.slane %v766_v39, 1  ;;  %v761_v43 = vrot.slane %v759_v12, 1  ;;  %v5071_v12 = vld [vmem:[%s6586_s4 + $0xd0] sm:$0xff]  }
  0x7a   :  { %4901 = vmatprep.subr.bf16.mxu1 %v5046_v35 }
  0x7b   :  { %v769_v17 = vor.u32 %v768_v45, %v764_v13  ;;  %v762_v19 = vsel %vm39_vm0, %v757_v18, %v761_v43  ;;  %v5072_v13 = vld [vmem:[%s6586_s4 + $0x10] sm:$0xff]   ;;  %v5076_v45 = vld [vmem:[%s6586_s4 + $0x8] sm:$0xff]   ;;  %v5078_v18 = vld [vmem:[%s6586_s4 + $0x40] sm:$0xff]  }
  0x7c   :  { %4658 = vmatpush3.bf16.msra.mxu0 %v5045_v22 }
  0x7d   :  { %4659 = vmatprep.subr.bf16.mxu0 %v5047_v27  ;;  %4902 = vmatpush3.bf16.msra.mxu1 %v5046_v35  ;;  %v774_v42 = vsel %vm39_vm0, %v769_v17, %v773_v15  ;;  %v5050_v35 = vld [vmem:[%s6586_s4 + $0x78] sm:$0xff]   ;;  %v5077_v17 = vld [vmem:[%s6586_s4 + $0x88] sm:$0xff]  }
  0x7e   :  { %4903 = vmatprep.subr.bf16.mxu1 %v5049_v1 }
  0x80   :  { %4660 = vmatpush3.bf16.msra.mxu0 %v5048_v55 }
  0x81   :  { %4904 = vmatpush3.bf16.msra.mxu1 %v5049_v1  ;;  %4683 = vmatprep.subr.bf16.mxu0 %v5050_v35 }
  0x82   :  { %4711 = vmatprep.subr.bf16.mxu1 %v5051_v52 }
  0x83   :  { %1864 = vmatmul.mubr.bf16.vlgmr.msra.gmra.mxu0 %v594_v28  ;;  %v5064_v28 = vld [vmem:[%s6586_s4 + $0x20] sm:$0xff]  }
  0x84   :  { %4906 = vmatmul.mubr.bf16.vlgmr.msra.gmra.mxu1 %v786_v40  ;;  %1871 = vmatprep.mubr.bf16.mxu0 %v774_v42  ;;  %v5075_v40 = vld [vmem:[%s6586_s4 + $0xc8] sm:$0xff]   ;;  %v5079_v42 = vld [vmem:[%s6586_s4 + $0xc0] sm:$0xff]  }
  0x85   :  { %4684 = vmatpush3.bf16.msra.mxu0 %v5052_v54  ;;  %4712 = vmatpush3.bf16.msra.mxu1 %v5053_v58  ;;  %v5081_v54 = vld [vmem:[%s6586_s4 + $0x80] sm:$0xff]  }
  0x86   :  { %4685 = vmatprep.subr.bf16.mxu0 %v5054_v60  ;;  %4713 = vmatprep.subr.bf16.mxu1 %v5055_v53  ;;  %v5086_v60 = vld [vmem:[%s6586_s4 + $0x178] sm:$0xff]  }
  0x89   :  { %4686 = vmatpush3.bf16.msra.mxu0 %v5056_v61  ;;  %4714 = vmatpush3.bf16.msra.mxu1 %v5057_v63 }
  0x8a   :  { %4687 = vmatprep.subr.bf16.mxu0 %v5058_v0  ;;  %4715 = vmatprep.subr.bf16.mxu1 %v5059_v50 }
  0x8b   :  { %1872 = vmatmul.mubr.bf16.gmra.mxu0 %v762_v19  ;;  %v5080_v19 = vld [vmem:[%s6586_s4] sm:$0xff]  }
  0x8d   :  { %4688 = vmatpush3.bf16.msra.mxu0 %v5060_v59  ;;  %4716 = vmatpush3.bf16.msra.mxu1 %v5061_v2 }
  0x8e   :  { %4689 = vmatprep.subr.bf16.mxu0 %v5062_v3  ;;  %4717 = vmatprep.subr.bf16.mxu1 %v5063_v5 }
  0x91   :  { %4690 = vmatpush3.bf16.msra.mxu0 %v5064_v28  ;;  %4718 = vmatpush3.bf16.msra.mxu1 %v5065_v51 }
  0x92   :  { %4691 = vmatprep.subr.bf16.mxu0 %v5066_v57  ;;  %4719 = vmatprep.subr.bf16.mxu1 %v5067_v7 }
  0x95   :  { %4692 = vmatpush3.bf16.msra.mxu0 %v5068_v8  ;;  %4720 = vmatpush3.bf16.msra.mxu1 %v5069_v10 }
  0x96   :  { %4693 = vmatprep.subr.bf16.mxu0 %v5070_v56  ;;  %4721 = vmatprep.subr.bf16.mxu1 %v5071_v12 }
  0x99   :  { %4694 = vmatpush3.bf16.msra.mxu0 %v5072_v13  ;;  %4722 = vmatpush3.bf16.msra.mxu1 %v5073_v44 }
  0x9a   :  { %4695 = vmatprep.subr.bf16.mxu0 %v5074_v14  ;;  %4723 = vmatprep.subr.bf16.mxu1 %v5075_v40 }
  0x9d   :  { %4696 = vmatpush3.bf16.msra.mxu0 %v5076_v45  ;;  %4724 = vmatpush3.bf16.msra.mxu1 %v5077_v17 }
  0x9e   :  { %4697 = vmatprep.subr.bf16.mxu0 %v5078_v18  ;;  %4725 = vmatprep.subr.bf16.mxu1 %v5079_v42 }
  0xa1   :  { %4698 = vmatpush3.bf16.msra.mxu0 %v5080_v19  ;;  %4726 = vmatpush3.bf16.msra.mxu1 %v5081_v54 }
  0xa2   :  { %4739 = vmatprep.subr.bf16.mxu0 %v5086_v60  ;;  %4767 = vmatprep.subr.bf16.mxu1 %v5087_v48 }
  0xe3   :  { %v5820_v20 = vpop.f32.mrf.mxu0 }
  0xe4   :  { %v5824_v22 = vpop.f32.mrf.mxu1 }
  0xe5   :  { %v5822_v21 = vpop.f32.mrf.mxu0 }
  0xe6   :  { %v5828_v24 = vpop.f32.mrf.mxu1  ;;  %v4495_v28 = vadd.f32 %v5822_v21, %v5820_v20 }
  0xe7   :  { %v5826_v23 = vpop.f32.mrf.mxu0  ;;  %v4523_v51 = vadd.f32 %v5828_v24, %v5824_v22 }
  0xe8   :  { %v5832_v26 = vpop.f32.mrf.mxu1 }
  0xe9   :  { %v5830_v25 = vpop.f32.mrf.mxu0  ;;  %v1621_v12 = vadd.f32 %v4523_v51, %v4495_v28 }
  0xea   :  { %v5836_v36 = vpop.f32.mrf.mxu1  ;;  %v4498_v3 = vadd.f32 %v5830_v25, %v5826_v23 }
  0xeb   :  { %v4526_v5 = vadd.f32 %v5836_v36, %v5832_v26 }
  0xed   :  { %v1624_v56 = vadd.f32 %v4526_v5, %v4498_v3 }
  0xf3   :  { %v5834_v27 = vpop.f32.mrf.mxu0 }
  0xf4   :  { %v5840_v37 = vpop.f32.mrf.mxu1 }
  0xf5   :  { %v5838_v29 = vpop.f32.mrf.mxu0 }
  0xf6   :  { %v5844_v31 = vpop.f32.mrf.mxu1  ;;  %v4501_v23 = vadd.f32 %v5838_v29, %v5834_v27 }
  0xf7   :  { %v5842_v30 = vpop.f32.mrf.mxu0  ;;  %v4529_v25 = vadd.f32 %v5844_v31, %v5840_v37 }
  0xf8   :  { %v5848_v33 = vpop.f32.mrf.mxu1 }
  0xf9   :  { %v5846_v32 = vpop.f32.mrf.mxu0 }
  0xfa   :  { %v5855_v38 = vpop.f32.mrf.mxu1  ;;  %v4504_v27 = vadd.f32 %v5846_v32, %v5842_v30 }
  0xfb   :  { %v4532_v29 = vadd.f32 %v5855_v38, %v5848_v33 }
  0xfd   :  { %v1632_v14 = vadd.f32 %v4532_v29, %v4504_v27 }
 0x103   :  { %v5850_v34 = vpop.f32.mrf.mxu0 }
 0x104   :  { %v5865_v55 = vpop.f32.mrf.mxu1 }
 0x105   :  { %v5857_v49 = vpop.f32.mrf.mxu0 }
 0x106   :  { %v5881_v62 = vpop.f32.mrf.mxu1  ;;  %v4551_v8 = vadd.f32 %v5857_v49, %v5850_v34 }
 0x107   :  { %v5873_v41 = vpop.f32.mrf.mxu0  ;;  %v4579_v26 = vadd.f32 %v5881_v62, %v5865_v55 }
 0x108   :  { %v5897_v1 = vpop.f32.mrf.mxu1  ;;  %v1670_v24 = vadd.f32 %v4551_v8, %v1621_v12 }
 0x109   :  { %v5889_v46 = vpop.f32.mrf.mxu0 }
 0x10a   :  { %v5913_v47 = vpop.f32.mrf.mxu1  ;;  %v4554_v7 = vadd.f32 %v5889_v46, %v5873_v41  ;;  %v1629_v41 = vadd.f32 %v4529_v25, %v4501_v23 }
 0x10b   :  { %v5905_v4 = vpop.f32.mrf.mxu0  ;;  %v4582_v22 = vadd.f32 %v5913_v47, %v5897_v1  ;;  %v1719_v47 = vadd.f32 %v4579_v26, %v1670_v24 }
 0x10c   :  { %v5929_v9 = vpop.f32.mrf.mxu1  ;;  %v1673_v21 = vadd.f32 %v4554_v7, %v1624_v56 }
 0x10d   :  { %v5921_v6 = vpop.f32.mrf.mxu0 }
 0x10e   :  { %v5945_v39 = vpop.f32.mrf.mxu1  ;;  %v4557_v36 = vadd.f32 %v5921_v6, %v5905_v4  ;;  %v1722_v1 = vadd.f32 %v4582_v22, %v1673_v21 }
 0x10f   :  { %v5937_v11 = vpop.f32.mrf.mxu0  ;;  %v4585_v55 = vadd.f32 %v5945_v39, %v5929_v9 }
 0x110   :  { %v5961_v16 = vpop.f32.mrf.mxu1  ;;  %v1678_v13 = vadd.f32 %v4557_v36, %v1629_v41 }
 0x111   :  { %v5953_v15 = vpop.f32.mrf.mxu0 }
 0x112   :  { %v4587_v35 = vpop.f32.mrf.mxu1  ;;  %v4560_v62 = vadd.f32 %v5953_v15, %v5937_v11  ;;  %v1727_v45 = vadd.f32 %v4585_v55, %v1678_v13 }
 0x113   :  { %v4588_v17 = vadd.f32 %v4587_v35, %v5961_v16 }
 0x123   :  { %v4605_v43 = vpop.f32.mrf.mxu0 }
 0x124   :  { %v4633_v58 = vpop.f32.mrf.mxu1 }
 0x125   :  { %v4606_v52 = vpop.f32.mrf.mxu0 }
 0x126   :  { %v4634_v61 = vpop.f32.mrf.mxu1  ;;  %v4607_v37 = vadd.f32 %v4606_v52, %v4605_v43  ;;  %v1681_v43 = vadd.f32 %v4560_v62, %v1632_v14 }
 0x127   :  { %v4608_v53 = vpop.f32.mrf.mxu0  ;;  %v4635_v32 = vadd.f32 %v4634_v61, %v4633_v58 }
 0x128   :  { %v4636_v0 = vpop.f32.mrf.mxu1  ;;  %v1768_v30 = vadd.f32 %v4607_v37, %v1719_v47  ;;  %v1730_v58 = vadd.f32 %v4588_v17, %v1681_v43 }
 0x129   :  { %v4609_v63 = vpop.f32.mrf.mxu0 }
 0x12a   :  { %v4637_v59 = vpop.f32.mrf.mxu1  ;;  %v4610_v49 = vadd.f32 %v4609_v63, %v4608_v53  ;;  %v1817_v52 = vadd.f32 %v4635_v32, %v1768_v30 }
 0x12b   :  { %v4611_v50 = vpop.f32.mrf.mxu0  ;;  %v4638_v44 = vadd.f32 %v4637_v59, %v4636_v0 }
 0x12c   :  { %v1771_v6 = vadd.f32 %v4610_v49, %v1722_v1 }
 0x12d   :  { %v4612_v2 = vpop.f32.mrf.mxu0 }
 0x12e   :  { %v4613_v40 = vadd.f32 %v4612_v2, %v4611_v50  ;;  %v1820_v9 = vadd.f32 %v4638_v44, %v1771_v6 }
 0x12f   :  { %v4639_v57 = vpop.f32.mrf.mxu1  ;;  %v4614_v10 = vpop.f32.mrf.mxu0 }
 0x130   :  { %v1776_v11 = vadd.f32 %v4613_v40, %v1727_v45  ;;  %v1956_v45 = vld [vmem:[%s6587_s2] sm:$0x1] }
 0x131   :  { %v4640_v20 = vpop.f32.mrf.mxu1  ;;  %v4615_v34 = vpop.f32.mrf.mxu0 }
 0x132   :  { %v4641_v15 = vadd.f32 %v4640_v20, %v4639_v57  ;;  %v4616_v54 = vadd.f32 %v4615_v34, %v4614_v10 }
 0x133   :  { %v4642_v31 = vpop.f32.mrf.mxu1 }
 0x134   :  { %v1825_v50 = vadd.f32 %v4641_v15, %v1776_v11  ;;  %v1779_v59 = vadd.f32 %v4616_v54, %v1730_v58 }
 0x135   :  { %v4643_v33 = vpop.f32.mrf.mxu1 }
 0x136   :  { %v4644_v2 = vadd.f32 %v4643_v33, %v4642_v31  ;;  %v1964_v33 = vlaneseq }
 0x138   :  { %v1828_v8 = vadd.f32 %v4644_v2, %v1779_v59 }
 0x143   :  { %v4661_v46 = vpop.f32.mrf.mxu0 }
 0x144   :  { %v4907_v42 = vpop.f32.mrf.mxu1 }
 0x145   :  { %v4662_v4 = vpop.f32.mrf.mxu0 }
 0x146   :  { %v4663_v18 = vadd.f32 %v4662_v4, %v4661_v46  ;;  %v1914_v60 = vpop.f32.mrf.mxu1 }
 0x147   :  { %v4664_v38 = vpop.f32.mrf.mxu0 }
 0x148   :  { %v1866_v61 = vadd.f32 %v4663_v18, %v1817_v52  ;;  %v4908_v63 = vpop.f32.mrf.mxu1 }
 0x149   :  { %v4665_v19 = vpop.f32.mrf.mxu0 }
 0x14a   :  { %v4666_v39 = vadd.f32 %v4665_v19, %v4664_v38  ;;  %v1917_v16 = vpop.f32.mrf.mxu1  ;;  %v1915_v28 = vadd.f32 %v1914_v60, %v1866_v61  ;;  %v1965_v38 = vshrl.u32 %v1964_v33, 7 }
 0x14b   :  { %v4667_v48 = vpop.f32.mrf.mxu0 }
 0x14c   :  { %v1869_v53 = vadd.f32 %v4666_v39, %v1820_v9  ;;  %v1938_v12 = vmul.f32 %v1915_v28, %v1915_v28  ;;  %v6018_v43 = vsub.s32 0, %v1965_v38 }
 0x14d   :  { %v4668_v0 = vpop.f32.mrf.mxu0 }
 0x14e   :  { %v4669_v35 = vadd.f32 %v4668_v0, %v4667_v48  ;;  %v1918_v3 = vadd.f32 %v1917_v16, %v1869_v53 }
 0x14f   :  { %v4670_v5 = vpop.f32.mrf.mxu0 }
 0x150   :  { %v1874_v51 = vadd.f32 %v4669_v35, %v1825_v50  ;;  %v1939_v57 = vmul.f32 %v1918_v3, %v1918_v3  ;;  %v1929_v23 = vadd.f32 %v1918_v3, %v1915_v28 }
 0x151   :  { %v4671_v7 = vpop.f32.mrf.mxu0 }
 0x152   :  { %v1923_v10 = vadd.f32 %v4907_v42, %v1874_v51  ;;  %v4672_v56 = vadd.f32 %v4671_v7, %v4670_v5  ;;  %v1942_v21 = vadd.f32 %v1939_v57, %v1938_v12  ;;  %v1960_v42 = vld [vmem:[%s6588_s3] sm:$0x1]  ;;  %v2021_v57 = vld [vmem:[#allocation2] sm:$0xc] }
 0x154   :  { %v1940_v25 = vmul.f32 %v1923_v10, %v1923_v10  ;;  %v1877_v20 = vadd.f32 %v4672_v56, %v1828_v8  ;;  %v1930_v22 = vadd.f32 %v1929_v23, %v1923_v10  ;;  %v2017_v8 = vld [vmem:[#allocation2] sm:$0xe] }
 0x156   :  { %v1926_v24 = vadd.f32 %v4908_v63, %v1877_v20  ;;  %v1943_v26 = vadd.f32 %v1942_v21, %v1940_v25  ;;  %v6025_v63 = vld [vmem:[#allocation2 + $0xc] ss:$0 sps:$4 sm:$0x33]   ;;  %v2025_v20 = vld [vmem:[#allocation2] sm:$0x8] }
 0x157   :  { %v2309_v7 = vshll.u32 %v6025_v63, 16 }
 0x158   :  { %v1931_v36 = vadd.f32 %v1930_v22, %v1926_v24  ;;  %v1941_v34 = vmul.f32 %v1926_v24, %v1926_v24 }
 0x159   :  { %v6031_v25 = vrot.slane %v2309_v7, 2 }
 0x15a   :  { %v1932_v49 = vrot.slane %v1931_v36, 4  ;;  %v1944_v41 = vadd.f32 %v1943_v26, %v1941_v34 }
 0x15c   :  { %v1933_v27 = vadd.f32 %v1932_v49, %v1931_v36  ;;  %v1945_v29 = vrot.slane %v1944_v41, 4 }
 0x15e   :  { %v1934_v37 = vrot.slane %v1933_v27, 2  ;;  %v1946_v31 = vadd.f32 %v1945_v29, %v1944_v41 }
 0x160   :  { %v1935_v46 = vadd.f32 %v1934_v37, %v1933_v27  ;;  %v1947_v1 = vrot.slane %v1946_v31, 2 }
 0x162   :  { %v1936_v47 = vrot.slane %v1935_v46, 1  ;;  %v1948_v13 = vadd.f32 %v1947_v1, %v1946_v31 }
 0x164   :  { %v1937_v55 = vadd.f32 %v1936_v47, %v1935_v46  ;;  %v1949_v62 = vrot.slane %v1948_v13, 1 }
 0x166   :  { %v1950_v4 = vadd.f32 %v1949_v62, %v1948_v13  ;;  %v1951_v6 = vmul.f32 0.03125, %v1937_v55 }
 0x168   :  { %v1952_v44 = vmul.f32 0.03125, %v1950_v4  ;;  %v1953_v14 = vmul.f32 %v1951_v6, %v1951_v6  ;;  %v2018_v4 = vld [vmem:[#allocation2 + $0x10] sm:$0xe] }
 0x16a   :  { %v1954_v30 = vsub.f32 %v1952_v44, %v1953_v14 }
 0x16c   :  { %v1955_v32 = vmax.f32 %v1954_v30, 0.0 }
 0x16e   :  { %v1957_v40 = vadd.f32 1e-05, %v1955_v32 }
 0x170   :  { %5203 = vrsqrt.f32 %v1957_v40 }
 0x17d   :  { %v5204_v17 = vpop.eup %5203 }
 0x17e   :  { %v1959_v18 = vmul.f32 %v5204_v17, %v1956_v45 }
 0x180   :  { %v1961_v19 = vmul.f32 %v1959_v18, %v1951_v6  ;;  %v1967_v9 = vrot.slane %v1959_v18, %v6018_v43 }
 0x182   :  { %v1962_v39 = vsub.f32 %v1960_v42, %v1961_v19  ;;  %v1969_v52 = vmul.f32 %v1967_v9, %v1915_v28  ;;  %v1970_v11 = vmul.f32 %v1967_v9, %v1918_v3  ;;  %v1971_v15 = vmul.f32 %v1967_v9, %v1923_v10  ;;  %v5142_v3 = vld [vmem:[#allocation2 + $0xc] ss:$0 sps:$4 sm:$0x11]   ;;  %v2011_v10 = vld [vmem:[#allocation2] sm:$0xf] }
 0x183   :  { %v1972_v54 = vmul.f32 %v1967_v9, %v1926_v24  ;;  %v2306_v28 = vshrl.u32 %v6025_v63, 16  ;;  %v2259_v56 = vshll.u32 %v5142_v3, 16  ;;  %v2263_v12 = vshrl.u32 %v5142_v3, 16 }
 0x184   :  { %v1977_v60 = vrot.slane %v1962_v39, %v6018_v43 }
 0x185   :  { %v6029_v23 = vrot.slane %v2306_v28, 1  ;;  %v6043_v41 = vrot.slane %v2259_v56, 1  ;;  %v6045_v27 = vshll.u32 %v2263_v12, 16 }
 0x186   :  { %v1979_v48 = vadd.f32 %v1977_v60, %v1969_v52  ;;  %v1980_v53 = vadd.f32 %v1977_v60, %v1970_v11  ;;  %v1981_v58 = vadd.f32 %v1977_v60, %v1971_v15  ;;  %v1982_v61 = vadd.f32 %v1977_v60, %v1972_v54 }
 0x187   :  { %v2312_v29 = vor.u32 %v6031_v25, %v6029_v23 }
 0x188   :  { %v1983_v0 = vmax.f32 %v1979_v48, 0.0  ;;  %v1984_v50 = vmax.f32 %v1980_v53, 0.0  ;;  %v1985_v59 = vmax.f32 %v1981_v58, 0.0  ;;  %v1986_v2 = vmax.f32 %v1982_v61, 0.0 }
 0x18a   :  { %v4473_v16 = vpack.c.bf16 %v1983_v0, %v1983_v0  ;;  %v4474_v35 = vpack.c.bf16 %v1984_v50, %v1984_v50  ;;  %v4475_v5 = vpack.c.bf16 %v1985_v59, %v1985_v59  ;;  %v4476_v51 = vpack.c.bf16 %v1986_v2, %v1986_v2 }
 0x18c   :  { %2007 = vst [vmem:[#allocation2 + $0x4] sm:$0xf] %v4473_v16  ;;  %2008 = vst [vmem:[#allocation2 + $0x8] sm:$0xf] %v4474_v35 }
 0x18d   :  { %2009 = vst [vmem:[#allocation2 + $0x14] sm:$0xf] %v4475_v5  ;;  %2010 = vst [vmem:[#allocation2 + $0x18] sm:$0xf] %v4476_v51 }
 0x193   :  { %v6033_v21 = vld [vmem:[#allocation2 + $0x4] sm:$0xf]  ;;  %v5082_v22 = vld [vmem:[#allocation2 + $0x8] ss:$0 sps:$4 sm:$0x11]  }
 0x194   :  { %v4323_v24 = vcombine.low %v2017_v8, %v6033_v21  ;;  %v5084_v26 = vld [vmem:[#allocation2 + $0x8] ss:$0 sps:$4 sm:$0x33]   ;;  %v6037_v36 = vcombine.low %v2021_v57, %v6033_v21  ;;  %v4319_v34 = vcombine.low %v2011_v10, %v6033_v21  ;;  %v6041_v49 = vcombine.low %v2025_v20, %v6033_v21  ;;  %v6051_v45 = vld [vmem:[#allocation2 + $0x14] sm:$0xf] }
 0x195   :  { %v2077_v46 = vshll.u32 %v5082_v22, 16  ;;  %v2081_v1 = vshrl.u32 %v5082_v22, 16  ;;  %v2124_v55 = vshrl.u32 %v5084_v26, 16  ;;  %v2127_v62 = vshll.u32 %v5084_v26, 16  ;;  %v2022_v8 = vld [vmem:[#allocation2 + $0x10] sm:$0xc] }
 0x196   :  { %v2070_v37 = vshrl.u32 %v4323_v24, 16  ;;  %v2072_v31 = vshll.u32 %v4323_v24, 16  ;;  %v2116_v47 = vshrl.u32 %v6037_v36, 16  ;;  %v2119_v13 = vshll.u32 %v6037_v36, 16 }
 0x197   :  { %v2079_v44 = vrot.slane %v2077_v46, 1  ;;  %v2651_v14 = vshll.u32 %v2081_v1, 16  ;;  %v2636_v30 = vshrl.u32 %v4319_v34, 16  ;;  %v2126_v33 = vrot.slane %v2124_v55, 1 }
 0x198   :  { %v2074_v6 = vrot.slane %v2072_v31, 1  ;;  %v2118_v32 = vrot.slane %v2116_v47, 1  ;;  %v2121_v40 = vrot.slane %v2119_v13, 2  ;;  %v2129_v38 = vrot.slane %v2127_v62, 2  ;;  %v5090_v31 = vld [vmem:[%s6586_s4 + $0x1b8] sm:$0xff]  }
 0x199   :  { %v2653_v18 = vrot.slane %v2651_v14, 1  ;;  %v2638_v42 = vshll.u32 %v4319_v34, 16  ;;  %v2103_v19 = vrot.slane %v4323_v24, 1  ;;  %v5091_v9 = vld [vmem:[#allocation2 + $0x18] ss:$0 sps:$4 sm:$0x11]   ;;  %v6055_v48 = vcombine.low %v2018_v4, %v6051_v45 }
 0x19a   :  { %v2075_v17 = vor.u32 %v2074_v6, %v2070_v37  ;;  %v2122_v39 = vor.u32 %v2121_v40, %v2118_v32  ;;  %v2130_v52 = vor.u32 %v2129_v38, %v2126_v33  ;;  %v2675_v11 = vshll.u32 %v2126_v33, 16  ;;  %v6059_v5 = vld [vmem:[#allocation2 + $0x18] ss:$0 sps:$4 sm:$0x33]   ;;  %v2014_v13 = vld [vmem:[#allocation2 + $0x10] sm:$0xf] }
 0x19b   :  { %v2104_v15 = vrot.slane %v5084_v26, 1  ;;  %v2640_v60 = vrot.slane %v2638_v42, 1  ;;  %v2091_v53 = vshll.u32 %v5091_v9, 16  ;;  %v2084_v56 = vshrl.u32 %v6055_v48, 16  ;;  %v5089_v37 = vld [vmem:[%s6586_s4 + $0x138] sm:$0xff]   ;;  %v5096_v38 = vld [vmem:[%s6586_s4 + $0x1f0] sm:$0xff]  }
 0x19c   :  { %v2080_v54 = vsel %vm39_vm0, %v2075_v17, %v2079_v44  ;;  %v2131_v0 = vsel %vm79_vm1, %v2122_v39, %v2130_v52  ;;  %v2677_v50 = vrot.slane %v2675_v11, 1  ;;  %v2086_v12 = vshll.u32 %v6055_v48, 16  ;;  %v6081_v14 = vld [vmem:[#allocation2 + $0x1c] ss:$0 sps:$4 sm:$0x11]   ;;  %v5097_v52 = vld [vmem:[%s6586_s4 + $0x130] sm:$0xff]  }
 0x19d   :  { %v2644_v58 = vshrl.u32 %v2080_v54, 16  ;;  %v2646_v61 = vshll.u32 %v2080_v54, 16  ;;  %v2668_v59 = vshrl.u32 %v2131_v0, 16  ;;  %v2670_v2 = vshll.u32 %v2131_v0, 16  ;;  %v5099_v0 = vld [vmem:[%s6586_s4 + $0x168] sm:$0xff]  }
 0x19e   :  { %v2641_v16 = vor.u32 %v2640_v60, %v2636_v30  ;;  %v2105_v35 = vsel %vm72_vm2, %v2103_v19, %v2104_v15  ;;  %v2663_v7 = vshll.u32 %v2104_v15, 16  ;;  %v6064_v26 = vrot.slane %v2091_v53, 1  ;;  %v6098_v15 = vld [vmem:[#allocation2 + $0x8] ss:$0 sps:$4 sm:$0x77]  }
 0x19f   :  { %v2648_v51 = vrot.slane %v2646_v61, 1  ;;  %v2656_v3 = vshrl.u32 %v2105_v35, 16  ;;  %v2658_v28 = vshll.u32 %v2105_v35, 16  ;;  %v2672_v57 = vrot.slane %v2670_v2, 1  ;;  %v5098_v61 = vld [vmem:[%s6586_s4 + $0x1b0] sm:$0xff]  }
 0x1a0   :  { %v2642_v10 = vsel %vm39_vm0, %v2641_v16, %v2079_v44  ;;  %v2665_v24 = vrot.slane %v2663_v7, 1  ;;  %v2088_v46 = vrot.slane %v2086_v12, 1  ;;  %v2095_v1 = vshrl.u32 %v5091_v9, 16  ;;  %v5095_v44 = vld [vmem:[%s6586_s4 + $0x170] sm:$0xff]   ;;  %v5100_v16 = vld [vmem:[%s6586_s4 + $0x1e8] sm:$0xff]  }
 0x1a1   :  { %v2649_v20 = vor.u32 %v2648_v51, %v2644_v58  ;;  %v2660_v22 = vrot.slane %v2658_v28, 1  ;;  %v2673_v34 = vor.u32 %v2672_v57, %v2668_v59  ;;  %v6073_v47 = vcombine.low %v2022_v8, %v6051_v45 }
 0x1a2   :  { %v2141_v4 = vshrl.u32 %v6059_v5, 16  ;;  %v2144_v6 = vshll.u32 %v6059_v5, 16  ;;  %v2089_v32 = vor.u32 %v2088_v46, %v2084_v56  ;;  %v2823_v40 = vshll.u32 %v2095_v1, 16  ;;  %v5102_v56 = vld [vmem:[%s6586_s4 + $0x128] sm:$0xff]  }
 0x1a3   :  { %v2654_v55 = vsel %vm39_vm0, %v2649_v20, %v2653_v18  ;;  %v2661_v62 = vor.u32 %v2660_v22, %v2656_v3  ;;  %v2678_v30 = vsel %vm39_vm0, %v2673_v34, %v2677_v50  ;;  %v2133_v33 = vshrl.u32 %v6073_v47, 16  ;;  %v5103_v34 = vld [vmem:[%s6586_s4 + $0x1a8] sm:$0xff]  }
 0x1a4   :  { %3761 = vmatprep.mubr.bf16.mxu0 %v2654_v55  ;;  %3810 = vmatprep.mubr.bf16.mxu1 %v2678_v30  ;;  %v2136_v18 = vshll.u32 %v6073_v47, 16  ;;  %v6090_v42 = vrot.slane %v2141_v4, 1  ;;  %v2146_v19 = vrot.slane %v2144_v6, 2  ;;  %v2094_v9 = vsel %vm39_vm0, %v2089_v32, %v6064_v26  ;;  %v6129_v55 = vld [vmem:[#allocation2 + $0x8] sm:$0xf]  ;;  %v5108_v32 = vld [vmem:[%s6586_s4 + $0x120] sm:$0xff]  }
 0x1a5   :  { %3762 = vmatmul.mubr.bf16.vlgmr.msra.gmra.mxu0 %v2642_v10  ;;  %v2666_v17 = vsel %vm39_vm0, %v2661_v62, %v2665_v24  ;;  %v2135_v39 = vrot.slane %v2133_v33, 1  ;;  %v4321_v11 = vcombine.low %v2014_v13, %v6051_v45  ;;  %v2767_v54 = vshll.u32 %v6029_v23, 16  ;;  %v5107_v62 = vld [vmem:[%s6586_s4 + $0x1e0] sm:$0xff]  }
 0x1a6   :  { %3811 = vmatmul.mubr.bf16.vlgmr.msra.gmra.mxu1 %v2666_v17  ;;  %4740 = vmatpush3.bf16.msra.mxu0 %v5089_v37  ;;  %v2818_v60 = vshll.u32 %v2094_v9, 16  ;;  %v2138_v53 = vrot.slane %v2136_v18, 2  ;;  %v2147_v58 = vor.u32 %v2146_v19, %v6090_v42  ;;  %v2273_v50 = vshll.u32 %v6081_v14, 16  ;;  %v5106_v37 = vld [vmem:[%s6586_s4 + $0x160] sm:$0xff]  }
 0x1a7   :  { %4768 = vmatpush3.bf16.msra.mxu1 %v5090_v31  ;;  %4741 = vmatprep.subr.bf16.mxu0 %v5095_v44  ;;  %v2816_v59 = vshrl.u32 %v2094_v9, 16  ;;  %v2825_v2 = vrot.slane %v2823_v40, 1  ;;  %v2810_v35 = vshll.u32 %v4321_v11, 16  ;;  %v2106_v51 = vrot.slane %v6055_v48, 1 }
 0x1a8   :  { %4769 = vmatprep.subr.bf16.mxu1 %v5096_v38  ;;  %v2820_v3 = vrot.slane %v2818_v60, 1  ;;  %v2139_v28 = vor.u32 %v2138_v53, %v2135_v39  ;;  %v2107_v7 = vrot.slane %v6059_v5, 1  ;;  %v2168_v8 = vshrl.u32 %v6041_v49, 16  ;;  %v6140_v18 = vld [vmem:[#allocation2 + $0x1c] ss:$0 sps:$4 sm:$0x33]  }
 0x1a9   :  { %v2808_v57 = vshrl.u32 %v4321_v11, 16  ;;  %v2812_v10 = vrot.slane %v2810_v35, 1  ;;  %v2171_v12 = vshll.u32 %v6041_v49, 16  ;;  %v2176_v20 = vshrl.u32 %v6098_v15, 16  ;;  %v5109_v39 = vld [vmem:[%s6586_s4 + $0x1a0] sm:$0xff]   ;;  %v5110_v53 = vld [vmem:[%s6586_s4 + $0x158] sm:$0xff]  }
 0x1aa   :  { %4742 = vmatpush3.bf16.msra.mxu0 %v5097_v52  ;;  %v2821_v22 = vor.u32 %v2820_v3, %v2816_v59  ;;  %v2148_v48 = vsel %vm79_vm1, %v2139_v28, %v2147_v58  ;;  %v2847_v24 = vshll.u32 %v6090_v42, 16  ;;  %v2108_v5 = vsel %vm72_vm2, %v2106_v51, %v2107_v7  ;;  %v5112_v35 = vld [vmem:[%s6586_s4 + $0x118] sm:$0xff]  }
 0x1ab   :  { %4770 = vmatpush3.bf16.msra.mxu1 %v5098_v61  ;;  %4743 = vmatprep.subr.bf16.mxu0 %v5099_v0  ;;  %v2840_v31 = vshrl.u32 %v2148_v48, 16  ;;  %v2842_v46 = vshll.u32 %v2148_v48, 16  ;;  %v2813_v1 = vor.u32 %v2812_v10, %v2808_v57  ;;  %v2835_v13 = vshll.u32 %v2107_v7, 16  ;;  %v5113_v10 = vld [vmem:[%s6586_s4 + $0x198] sm:$0xff]  }
 0x1ac   :  { %4771 = vmatprep.subr.bf16.mxu1 %v5100_v16  ;;  %v2826_v4 = vsel %vm39_vm0, %v2821_v22, %v2825_v2  ;;  %v2828_v6 = vshrl.u32 %v2108_v5, 16  ;;  %v2830_v44 = vshll.u32 %v2108_v5, 16  ;;  %v2170_v30 = vrot.slane %v2168_v8, 2  ;;  %v5111_v2 = vld [vmem:[%s6586_s4 + $0x1d8] sm:$0xff]  }
 0x1ad   :  { %3769 = vmatprep.mubr.bf16.mxu0 %v2826_v4  ;;  %v2844_v40 = vrot.slane %v2842_v46, 1  ;;  %v2814_v33 = vsel %vm39_vm0, %v2813_v1, %v6064_v26  ;;  %v2173_v38 = vrot.slane %v2171_v12, 3  ;;  %v2178_v17 = vrot.slane %v2176_v20, 2  ;;  %v5115_v12 = vld [vmem:[%s6586_s4 + $0x1d0] sm:$0xff]  }
 0x1ae   :  { %4744 = vmatpush3.bf16.msra.mxu0 %v5102_v56  ;;  %v2832_v42 = vrot.slane %v2830_v44, 1  ;;  %v2179_v19 = vshll.u32 %v6098_v15, 16  ;;  %v4335_v9 = vcombine.low %v6033_v21, %v6129_v55  ;;  %v2155_v52 = vrot.slane %v6037_v36, 2  ;;  %v5114_v56 = vld [vmem:[%s6586_s4 + $0x150] sm:$0xff]  }
 0x1af   :  { %3770 = vmatmul.mubr.bf16.gmra.mxu0 %v2814_v33  ;;  %4772 = vmatpush3.bf16.msra.mxu1 %v5103_v34  ;;  %v2845_v26 = vor.u32 %v2844_v40, %v2840_v31  ;;  %v2849_v11 = vrot.slane %v2847_v24, 1  ;;  %v2837_v60 = vrot.slane %v2835_v13, 1  ;;  %v2156_v58 = vrot.slane %v6098_v15, 2  ;;  %v2026_v15 = vld [vmem:[#allocation2 + $0x10] sm:$0x8] }
 0x1b0   :  { %4745 = vmatprep.subr.bf16.mxu0 %v5106_v37  ;;  %4773 = vmatprep.subr.bf16.mxu1 %v5107_v62  ;;  %v2833_v61 = vor.u32 %v2832_v42, %v2828_v6  ;;  %v2174_v0 = vor.u32 %v2173_v38, %v2170_v30  ;;  %v2181_v21 = vrot.slane %v2179_v19, 3  ;;  %v2216_v59 = vshrl.u32 %v4335_v9, 16  ;;  %v6180_v31 = vld [vmem:[#allocation2 + $0x18] ss:$0 sps:$4 sm:$0x77]   ;;  %v5117_v44 = vld [vmem:[%s6586_s4 + $0x190] sm:$0xff]  }
 0x1b1   :  { %v2850_v36 = vsel %vm39_vm0, %v2845_v26, %v2849_v11  ;;  %v2699_v16 = vshll.u32 %v2178_v17, 16  ;;  %v6161_v51 = vsel %vm94_vm4, %v2155_v52, %v2156_v58  ;;  %v2323_v3 = vshrl.u32 %v6140_v18, 16  ;;  %v5118_v30 = vld [vmem:[%s6586_s4 + $0x148] sm:$0xff]   ;;  %v6202_v11 = vld [vmem:[#allocation2 + $0x18] sm:$0xf] }
 0x1b2   :  { %4746 = vmatpush3.bf16.msra.mxu0 %v5108_v32  ;;  %3818 = vmatprep.mubr.bf16.mxu1 %v2850_v36  ;;  %v2838_v28 = vsel %vm39_vm0, %v2833_v61, %v2837_v60  ;;  %v2182_v7 = vor.u32 %v2181_v21, %v2178_v17  ;;  %v2218_v8 = vrot.slane %v2216_v59, 7  ;;  %v2219_v57 = vshll.u32 %v4335_v9, 16  ;;  %v5119_v17 = vld [vmem:[%s6586_s4 + $0x1c8] sm:$0xff]  }
 0x1b3   :  { %4774 = vmatpush3.bf16.msra.mxu1 %v5109_v39  ;;  %4747 = vmatprep.subr.bf16.mxu0 %v5110_v53  ;;  %v2682_v20 = vshll.u32 %v6161_v51, 16  ;;  %v4333_v22 = vcombine.low %v6129_v55, %v6129_v55  ;;  %v2207_v48 = vrot.slane %v6041_v49, 3  ;;  %v2326_v24 = vshll.u32 %v6140_v18, 16  ;;  %v5116_v55 = vld [vmem:[%s6586_s4 + $0x110] sm:$0xff]   ;;  %v5120_v53 = vld [vmem:[%s6586_s4 + $0x108] sm:$0xff]  }
 0x1b4   :  { %3819 = vmatmul.mubr.bf16.gmra.mxu1 %v2838_v28  ;;  %v2183_v5 = vsel %vm101_vm3, %v2174_v0, %v2182_v7  ;;  %v2221_v34 = vor.u32 %v2219_v57, %v2218_v8  ;;  %v2723_v37 = vshll.u32 %v2218_v8, 16  ;;  %4775 = vmatprep.subr.bf16.mxu1 %v5111_v2  ;;  %v6183_v46 = vcombine.low %v2026_v15, %v6051_v45  ;;  %v5121_v59 = vld [vmem:[%s6586_s4 + $0x188] sm:$0xff]   ;;  %v5122_v2 = vld [vmem:[%s6586_s4 + $0x140] sm:$0xff]  }
 0x1b5   :  { %v2694_v1 = vshll.u32 %v2183_v5, 16  ;;  %v2701_v13 = vrot.slane %v2699_v16, 1  ;;  %v6188_v49 = vshll.u32 %v2156_v58, 16  ;;  %v2208_v62 = vrot.slane %v4333_v22, 3  ;;  %v5123_v15 = vld [vmem:[%s6586_s4 + $0x1c0] sm:$0xff]  }
 0x1b6   :  { %4748 = vmatpush3.bf16.msra.mxu0 %v5112_v35  ;;  %v2692_v4 = vshrl.u32 %v2183_v5, 16  ;;  %v2718_v6 = vshll.u32 %v2221_v34, 16  ;;  %v2680_v32 = vshrl.u32 %v6161_v51, 16  ;;  %v2185_v40 = vshrl.u32 %v6183_v46, 16 }
 0x1b7   :  { %4776 = vmatpush3.bf16.msra.mxu1 %v5113_v10  ;;  %4749 = vmatprep.subr.bf16.mxu0 %v5114_v56  ;;  %v2696_v33 = vrot.slane %v2694_v1, 1  ;;  %v2716_v38 = vshrl.u32 %v2221_v34, 16  ;;  %v2684_v42 = vrot.slane %v2682_v20, 1  ;;  %v2209_v19 = vsel %vm116_vm6, %v2207_v48, %v2208_v62  ;;  %v5124_v20 = vld [vmem:[%s6586_s4 + $0x100] sm:$0xff]  }
 0x1b8   :  { %4777 = vmatprep.subr.bf16.mxu1 %v5115_v12  ;;  %v2720_v9 = vrot.slane %v2718_v6, 1  ;;  %v2725_v39 = vrot.slane %v2723_v37, 1  ;;  %v2706_v52 = vshll.u32 %v2209_v19, 16  ;;  %v2711_v26 = vshll.u32 %v2208_v62, 16  ;;  %v5127_v37 = vld [vmem:[%s6586_s4 + $0x278] sm:$0xff]  }
 0x1b9   :  { %v2697_v60 = vor.u32 %v2696_v33, %v2692_v4  ;;  %v2704_v58 = vshrl.u32 %v2209_v19, 16  ;;  %v2187_v61 = vrot.slane %v2185_v40, 2  ;;  %v2188_v0 = vshll.u32 %v6183_v46, 16 }
 0x1ba   :  { %4750 = vmatpush3.bf16.msra.mxu0 %v5116_v55  ;;  %v2721_v21 = vor.u32 %v2720_v9, %v2716_v38  ;;  %v2708_v36 = vrot.slane %v2706_v52, 1  ;;  %v2193_v16 = vshrl.u32 %v6180_v31, 16  ;;  %v2196_v35 = vshll.u32 %v6180_v31, 16  ;;  %v6237_v55 = vld [vmem:[#allocation2 + $0x8] sm:$0xf]  ;;  %v5132_v9 = vld [vmem:[%s6586_s4 + $0x238] sm:$0xff]  }
 0x1bb   :  { %4778 = vmatpush3.bf16.msra.mxu1 %v5117_v44  ;;  %4751 = vmatprep.subr.bf16.mxu0 %v5118_v30  ;;  %v2702_v51 = vsel %vm39_vm0, %v2697_v60, %v2701_v13  ;;  %v2190_v28 = vrot.slane %v2188_v0, 3  ;;  %v4336_v7 = vcombine.low %v6051_v45, %v6202_v11  ;;  %v2158_v8 = vrot.slane %v6073_v47, 2  ;;  %v5125_v45 = vld [vmem:[%s6586_s4 + $0x180] sm:$0xff]   ;;  %v5133_v52 = vld [vmem:[%s6586_s4 + $0x2b8] sm:$0xff]  }
 0x1bc   :  { %4779 = vmatprep.subr.bf16.mxu1 %v5119_v17  ;;  %3859 = vmatprep.mubr.bf16.mxu0 %v2702_v51  ;;  %v2726_v57 = vsel %vm39_vm0, %v2721_v21, %v2725_v39  ;;  %v2685_v10 = vor.u32 %v2684_v42, %v2680_v32  ;;  %v2195_v56 = vrot.slane %v2193_v16, 2  ;;  %v2198_v12 = vrot.slane %v2196_v35, 3  ;;  %v2035_v30 = vld [vmem:[#allocation2 + $0x4] sm:$0xe] }
 0x1bd   :  { %3908 = vmatprep.mubr.bf16.mxu1 %v2726_v57  ;;  %v2709_v22 = vor.u32 %v2708_v36, %v2704_v58  ;;  %v2191_v48 = vor.u32 %v2190_v28, %v2187_v61  ;;  %v2223_v5 = vshrl.u32 %v4336_v7, 16  ;;  %v2159_v34 = vrot.slane %v6180_v31, 2  ;;  %v5136_v28 = vld [vmem:[%s6586_s4 + $0x230] sm:$0xff]  }
 0x1be   :  { %4752 = vmatpush3.bf16.msra.mxu0 %v5120_v53  ;;  %v2689_v47 = vrot.slane %v6188_v49, 1  ;;  %v2199_v1 = vor.u32 %v2198_v12, %v2195_v56  ;;  %v4334_v13 = vcombine.low %v6202_v11, %v6202_v11  ;;  %v6241_v31 = vrot.slane %v2323_v3, 1  ;;  %v5128_v49 = vld [vmem:[%s6586_s4 + $0x2f8] sm:$0xff]  }
 0x1bf   :  { %4780 = vmatpush3.bf16.msra.mxu1 %v5121_v59  ;;  %4753 = vmatprep.subr.bf16.mxu0 %v5122_v2  ;;  %v2713_v62 = vrot.slane %v2711_v26, 1  ;;  %v2225_v4 = vrot.slane %v2223_v5, 7  ;;  %v2226_v6 = vshll.u32 %v4336_v7, 16  ;;  %v2160_v44 = vsel %vm94_vm4, %v2158_v8, %v2159_v34  ;;  %v5135_v26 = vld [vmem:[%s6586_s4 + $0x2f0] sm:$0xff]   ;;  %v2039_v59 = vld [vmem:[#allocation2 + $0x4] sm:$0xc] }
 0x1c0   :  { %4781 = vmatprep.subr.bf16.mxu1 %v5123_v15  ;;  %v2200_v32 = vsel %vm101_vm3, %v2191_v48, %v2199_v1  ;;  %v2871_v40 = vshll.u32 %v2195_v56, 16  ;;  %v2854_v33 = vshll.u32 %v2160_v44, 16  ;;  %v2210_v38 = vrot.slane %v6183_v46, 3  ;;  %v5134_v46 = vld [vmem:[%s6586_s4 + $0x270] sm:$0xff]  }
 0x1c1   :  { %v2690_v3 = vsel %vm39_vm0, %v2685_v10, %v2689_v47  ;;  %v2714_v17 = vsel %vm39_vm0, %v2709_v22, %v2713_v62  ;;  %v2866_v42 = vshll.u32 %v2200_v32, 16  ;;  %v2228_v19 = vor.u32 %v2226_v6, %v2225_v4  ;;  %v5137_v10 = vld [vmem:[%s6586_s4 + $0x2b0] sm:$0xff]   ;;  %v5140_v47 = vld [vmem:[%s6586_s4 + $0x2e8] sm:$0xff]  }
 0x1c2   :  { %4754 = vmatpush3.bf16.msra.mxu0 %v5124_v20  ;;  %v2895_v39 = vshll.u32 %v2225_v4, 16  ;;  %v2856_v11 = vrot.slane %v2854_v33, 1  ;;  %v2211_v60 = vrot.slane %v4334_v13, 3  ;;  %v6264_v53 = vcombine.low %v2035_v30, %v6237_v55  ;;  %v6290_v4 = vld [vmem:[#allocation2 + $0x18] sm:$0xf] }
 0x1c3   :  { %4782 = vmatpush3.bf16.msra.mxu1 %v5125_v45  ;;  %4795 = vmatprep.subr.bf16.mxu0 %v5127_v37  ;;  %v2864_v58 = vshrl.u32 %v2200_v32, 16  ;;  %v2868_v61 = vrot.slane %v2866_v42, 1  ;;  %v2890_v0 = vshll.u32 %v2228_v19, 16  ;;  %v2859_v21 = vshll.u32 %v2159_v34, 16  ;;  %v5139_v45 = vld [vmem:[%s6586_s4 + $0x268] sm:$0xff]  }
 0x1c4   :  { %4823 = vmatprep.subr.bf16.mxu1 %v5128_v49  ;;  %v2873_v2 = vrot.slane %v2871_v40, 1  ;;  %v2888_v36 = vshrl.u32 %v2228_v19, 16  ;;  %v2852_v16 = vshrl.u32 %v2160_v44, 16  ;;  %v2212_v35 = vsel %vm116_vm6, %v2210_v38, %v2211_v60  ;;  %v5141_v37 = vld [vmem:[%s6586_s4 + $0x228] sm:$0xff]   ;;  %v2036_v40 = vld [vmem:[#allocation2 + $0x14] sm:$0xe] }
 0x1c5   :  { %3860 = vmatmul.mubr.bf16.vlgmr.msra.gmra.mxu0 %v2690_v3  ;;  %v2869_v51 = vor.u32 %v2868_v61, %v2864_v58  ;;  %v2892_v15 = vrot.slane %v2890_v0, 1  ;;  %v2878_v7 = vshll.u32 %v2212_v35, 16  ;;  %v2883_v8 = vshll.u32 %v2211_v60, 16  ;;  %v2040_v33 = vld [vmem:[#allocation2 + $0x14] sm:$0xc]  ;;  %v5144_v3 = vld [vmem:[%s6586_s4 + $0x2a8] sm:$0xff]  }
 0x1c6   :  { %3909 = vmatmul.mubr.bf16.vlgmr.msra.gmra.mxu1 %v2714_v17  ;;  %4796 = vmatpush3.bf16.msra.mxu0 %v5132_v9  ;;  %v2897_v57 = vrot.slane %v2895_v39, 1  ;;  %v2857_v56 = vor.u32 %v2856_v11, %v2852_v16  ;;  %v2254_v12 = vshll.u32 %v6264_v53, 16  ;;  %v6275_v20 = vcombine.low %v2039_v59, %v6237_v55  ;;  %v5147_v19 = vld [vmem:[%s6586_s4 + $0x260] sm:$0xff]   ;;  %v6309_v11 = vld [vmem:[#allocation2 + $0xc] ss:$0 sps:$4 sm:$0x77]  }
 0x1c7   :  { %4824 = vmatpush3.bf16.msra.mxu1 %v5133_v52  ;;  %4797 = vmatprep.subr.bf16.mxu0 %v5134_v46  ;;  %v2874_v22 = vsel %vm39_vm0, %v2869_v51, %v2873_v2  ;;  %v2893_v48 = vor.u32 %v2892_v15, %v2888_v36  ;;  %v2876_v5 = vshrl.u32 %v2212_v35, 16  ;;  %v2880_v34 = vrot.slane %v2878_v7, 1  ;;  %v5151_v16 = vld [vmem:[%s6586_s4 + $0x258] sm:$0xff]   ;;  %v2043_v15 = vld [vmem:[#allocation2 + $0x4] sm:$0x8] }
 0x1c8   :  { %4825 = vmatprep.subr.bf16.mxu1 %v5135_v26  ;;  %3867 = vmatprep.mubr.bf16.mxu0 %v2874_v22  ;;  %v2252_v1 = vshrl.u32 %v6264_v53, 16  ;;  %v2256_v13 = vrot.slane %v2254_v12, 1  ;;  %v2298_v62 = vshrl.u32 %v6275_v20, 16  ;;  %v2301_v49 = vshll.u32 %v6275_v20, 16  ;;  %v5148_v26 = vld [vmem:[%s6586_s4 + $0x2e0] sm:$0xff]  }
 0x1c9   :  { %v2898_v6 = vsel %vm39_vm0, %v2893_v48, %v2897_v57  ;;  %v2861_v44 = vrot.slane %v2859_v21, 1  ;;  %v2881_v30 = vor.u32 %v2880_v34, %v2876_v5  ;;  %v2885_v32 = vrot.slane %v2883_v8, 1  ;;  %v5149_v21 = vld [vmem:[%s6586_s4 + $0x220] sm:$0xff]   ;;  %v5153_v5 = vld [vmem:[%s6586_s4 + $0x218] sm:$0xff]  }
 0x1ca   :  { %4798 = vmatpush3.bf16.msra.mxu0 %v5136_v28  ;;  %3916 = vmatprep.mubr.bf16.mxu1 %v2898_v6  ;;  %v2257_v38 = vor.u32 %v2256_v13, %v2252_v1  ;;  %v2300_v17 = vrot.slane %v2298_v62, 1  ;;  %v2303_v42 = vrot.slane %v2301_v49, 2  ;;  %v6301_v9 = vrot.slane %v2326_v24, 2  ;;  %v2029_v7 = vld [vmem:[#allocation2 + $0x4] sm:$0xf]  ;;  %v5156_v6 = vld [vmem:[%s6586_s4 + $0x2d0] sm:$0xff]  }
 0x1cb   :  { %4826 = vmatpush3.bf16.msra.mxu1 %v5137_v10  ;;  %v2862_v39 = vsel %vm39_vm0, %v2857_v56, %v2861_v44  ;;  %v2886_v52 = vsel %vm39_vm0, %v2881_v30, %v2885_v32  ;;  %4799 = vmatprep.subr.bf16.mxu0 %v5139_v45  ;;  %v2745_v46 = vrot.slane %v6045_v27, 1  ;;  %v6314_v58 = vcombine.low %v2036_v40, %v6290_v4  ;;  %v5154_v45 = vld [vmem:[%s6586_s4 + $0x298] sm:$0xff]  }
 0x1cc   :  { %4827 = vmatprep.subr.bf16.mxu1 %v5140_v47  ;;  %v2262_v60 = vsel %vm39_vm0, %v2257_v38, %v6043_v41  ;;  %v2304_v24 = vor.u32 %v2303_v42, %v2300_v17  ;;  %v6317_v61 = vcombine.low %v2040_v33, %v6290_v4  ;;  %v2769_v0 = vrot.slane %v2767_v54, 1  ;;  %v5150_v54 = vld [vmem:[%s6586_s4 + $0x2a0] sm:$0xff]   ;;  %v5157_v33 = vld [vmem:[%s6586_s4 + $0x210] sm:$0xff]   ;;  %v5159_v17 = vld [vmem:[%s6586_s4 + $0x248] sm:$0xff]  }
 0x1cd   :  { %3868 = vmatmul.mubr.bf16.gmra.mxu0 %v2862_v39  ;;  %v2738_v27 = vshll.u32 %v2262_v60, 16  ;;  %v2286_v59 = vrot.slane %v6025_v63, 1  ;;  %v6327_v2 = vrot.slane %v2273_v50, 1  ;;  %v5152_v63 = vld [vmem:[%s6586_s4 + $0x2d8] sm:$0xff]   ;;  %v2268_v50 = vshll.u32 %v6314_v58, 16 }
 0x1ce   :  { %3917 = vmatmul.mubr.bf16.gmra.mxu1 %v2886_v52  ;;  %4800 = vmatpush3.bf16.msra.mxu0 %v5141_v37  ;;  %v2313_v36 = vsel %vm79_vm1, %v2304_v24, %v2312_v29  ;;  %v2315_v35 = vshrl.u32 %v6317_v61, 16  ;;  %v2329_v23 = vor.u32 %v6301_v9, %v6241_v31  ;;  %v2736_v25 = vshrl.u32 %v2262_v60, 16  ;;  %v6393_v39 = vld [vmem:[#allocation2 + $0xc] ss:$0 sps:$4 sm:$0xff]  }
 0x1cf   :  { %4828 = vmatpush3.bf16.msra.mxu1 %v5144_v3  ;;  %4801 = vmatprep.subr.bf16.mxu0 %v5147_v19  ;;  %v2740_v29 = vrot.slane %v2738_v27, 1  ;;  %v2762_v51 = vshll.u32 %v2313_v36, 16  ;;  %v2358_v28 = vshrl.u32 %v6309_v11, 16  ;;  %v2266_v8 = vshrl.u32 %v6314_v58, 16  ;;  %v5160_v52 = vld [vmem:[%s6586_s4 + $0x2c8] sm:$0xff]  }
 0x1d0   :  { %4829 = vmatprep.subr.bf16.mxu1 %v5148_v26  ;;  %v2270_v57 = vrot.slane %v2268_v50, 1  ;;  %v2317_v10 = vrot.slane %v2315_v35, 1  ;;  %v2318_v56 = vshll.u32 %v6317_v61, 16  ;;  %v2760_v22 = vshrl.u32 %v2313_v36, 16  ;;  %v5163_v50 = vld [vmem:[%s6586_s4 + $0x240] sm:$0xff]  }
 0x1d1   :  { %v2741_v12 = vor.u32 %v2740_v29, %v2736_v25  ;;  %v2764_v48 = vrot.slane %v2762_v51, 1  ;;  %v2285_v34 = vrot.slane %v6264_v53, 1  ;;  %v6357_v1 = vcombine.low %v2043_v15, %v6237_v55  ;;  %v5155_v53 = vld [vmem:[%s6586_s4 + $0x250] sm:$0xff]  }
 0x1d2   :  { %4802 = vmatpush3.bf16.msra.mxu0 %v5149_v21  ;;  %v2271_v47 = vor.u32 %v2270_v57, %v2266_v8  ;;  %v2320_v37 = vrot.slane %v2318_v56, 2  ;;  %v2361_v13 = vshll.u32 %v6309_v11, 16  ;;  %v6368_v44 = vcombine.low %v2029_v7, %v6237_v55  ;;  %v5158_v55 = vld [vmem:[%s6586_s4 + $0x290] sm:$0xff]  }
 0x1d3   :  { %4830 = vmatpush3.bf16.msra.mxu1 %v5150_v54  ;;  %4803 = vmatprep.subr.bf16.mxu0 %v5151_v16  ;;  %v2746_v62 = vsel %vm39_vm0, %v2741_v12, %v2745_v46  ;;  %v2765_v49 = vor.u32 %v2764_v48, %v2760_v22  ;;  %v2350_v32 = vshrl.u32 %v6357_v1, 16  ;;  %v6376_v38 = vsel %vm72_vm2, %v2285_v34, %v2286_v59  ;;  %v5161_v54 = vld [vmem:[%s6586_s4 + $0x208] sm:$0xff]  }
 0x1d4   :  { %4831 = vmatprep.subr.bf16.mxu1 %v5152_v63  ;;  %3957 = vmatprep.mubr.bf16.mxu0 %v2746_v62  ;;  %v2321_v30 = vor.u32 %v2320_v37, %v2317_v10  ;;  %v6380_v3 = vsel %vm39_vm0, %v2271_v47, %v6327_v2  ;;  %v6391_v19 = vrot.slane %v2358_v28, 2  ;;  %v2363_v9 = vrot.slane %v2361_v13, 3  ;;  %v5165_v10 = vld [vmem:[%s6586_s4 + $0x200] sm:$0xff]   ;;  %v5169_v13 = vld [vmem:[%s6586_s4 + $0x3b8] sm:$0xff]  }
 0x1d5   :  { %v2770_v40 = vsel %vm39_vm0, %v2765_v49, %v2769_v0  ;;  %v2730_v46 = vshll.u32 %v6368_v44, 16  ;;  %v6399_v26 = vshll.u32 %v2286_v59, 16  ;;  %v2277_v60 = vshrl.u32 %v6081_v14, 16  ;;  %v2032_v0 = vld [vmem:[#allocation2 + $0x14] sm:$0xf]  ;;  %v5162_v14 = vld [vmem:[%s6586_s4 + $0x288] sm:$0xff]  }
 0x1d6   :  { %4804 = vmatpush3.bf16.msra.mxu0 %v5153_v5  ;;  %4006 = vmatprep.mubr.bf16.mxu1 %v2770_v40  ;;  %v6389_v42 = vsel %vm79_vm1, %v2321_v30, %v2329_v23  ;;  %v2750_v24 = vshll.u32 %v6376_v38, 16  ;;  %v2910_v27 = vshll.u32 %v6380_v3, 16  ;;  %v2352_v21 = vrot.slane %v2350_v32, 2  ;;  %v5166_v5 = vld [vmem:[%s6586_s4 + $0x280] sm:$0xff]  }
 0x1d7   :  { %4832 = vmatpush3.bf16.msra.mxu1 %v5154_v45  ;;  %4805 = vmatprep.subr.bf16.mxu0 %v5155_v53  ;;  %v2353_v36 = vshll.u32 %v6357_v1, 16  ;;  %v2934_v16 = vshll.u32 %v6389_v42, 16  ;;  %v2288_v59 = vrot.slane %v6314_v58, 1  ;;  %v2289_v63 = vrot.slane %v6140_v18, 1  ;;  %v5164_v18 = vld [vmem:[%s6586_s4 + $0x2c0] sm:$0xff]   ;;  %v5168_v45 = vld [vmem:[%s6586_s4 + $0x378] sm:$0xff]  }
 0x1d8   :  { %4833 = vmatprep.subr.bf16.mxu1 %v5156_v6  ;;  %v2364_v23 = vor.u32 %v2363_v9, %v6391_v19  ;;  %v2389_v25 = vrot.slane %v6357_v1, 3  ;;  %v2390_v29 = vrot.slane %v6393_v39, 3  ;;  %v2732_v58 = vrot.slane %v2730_v46, 1 }
 0x1d9   :  { %v2355_v35 = vrot.slane %v2353_v36, 3  ;;  %v2915_v51 = vshll.u32 %v2277_v60, 16  ;;  %v6424_v15 = vcombine.low %v2032_v0, %v6290_v4  ;;  %v2752_v28 = vrot.slane %v2750_v24, 1  ;;  %v5176_v60 = vld [vmem:[%s6586_s4 + $0x3b0] sm:$0xff]  }
 0x1da   :  { %4806 = vmatpush3.bf16.msra.mxu0 %v5157_v33  ;;  %v2757_v7 = vrot.slane %v6399_v26, 1  ;;  %v2912_v8 = vrot.slane %v2910_v27, 1  ;;  %v2728_v56 = vshrl.u32 %v6368_v44, 16  ;;  %v2936_v12 = vrot.slane %v2934_v16, 1  ;;  %v5177_v36 = vld [vmem:[%s6586_s4 + $0x330] sm:$0xff]  }
 0x1db   :  { %4834 = vmatpush3.bf16.msra.mxu1 %v5158_v55  ;;  %4807 = vmatprep.subr.bf16.mxu0 %v5159_v17  ;;  %v2356_v57 = vor.u32 %v2355_v35, %v2352_v21  ;;  %v2939_v22 = vshll.u32 %v6241_v31, 16  ;;  %v2290_v48 = vsel %vm72_vm2, %v2288_v59, %v2289_v63  ;;  %v2748_v34 = vshrl.u32 %v6376_v38, 16  ;;  %v5175_v17 = vld [vmem:[%s6586_s4 + $0x370] sm:$0xff]  }
 0x1dc   :  { %4835 = vmatprep.subr.bf16.mxu1 %v5160_v52  ;;  %v2908_v47 = vshrl.u32 %v6380_v3, 16  ;;  %v2391_v31 = vsel %vm116_vm6, %v2389_v25, %v2390_v29  ;;  %v2733_v1 = vor.u32 %v2732_v58, %v2728_v56  ;;  %v2917_v62 = vrot.slane %v2915_v51, 1  ;;  %v5174_v3 = vld [vmem:[%s6586_s4 + $0x338] sm:$0xff]   ;;  %v2044_v52 = vld [vmem:[#allocation2 + $0x14] sm:$0x8]  ;;  %v5185_v56 = vld [vmem:[%s6586_s4 + $0x360] sm:$0xff]  }
 0x1dd   :  { %v2365_v37 = vsel %vm101_vm3, %v2356_v57, %v2364_v23  ;;  %v2932_v49 = vshrl.u32 %v6389_v42, 16  ;;  %v2902_v53 = vshll.u32 %v6424_v15, 16  ;;  %v2753_v6 = vor.u32 %v2752_v28, %v2748_v34  ;;  %v5201_v34 = vld [vmem:[#allocation2 + $0x1c] ss:$0 sps:$4 sm:$0xff]  }
 0x1de   :  { %4808 = vmatpush3.bf16.msra.mxu0 %v5161_v54  ;;  %v2913_v44 = vor.u32 %v2912_v8, %v2908_v47  ;;  %v2922_v30 = vshll.u32 %v2290_v48, 16  ;;  %v2786_v32 = vshll.u32 %v2365_v37, 16  ;;  %v2941_v33 = vrot.slane %v2939_v22, 1 }
 0x1df   :  { %4836 = vmatpush3.bf16.msra.mxu1 %v5162_v14  ;;  %4809 = vmatprep.subr.bf16.mxu0 %v5163_v50  ;;  %v2937_v40 = vor.u32 %v2936_v12, %v2932_v49  ;;  %v2798_v38 = vshll.u32 %v2391_v31, 16  ;;  %v2734_v55 = vsel %vm39_vm0, %v2733_v1, %v6043_v41  ;;  %v2904_v42 = vrot.slane %v2902_v53, 1  ;;  %v5179_v50 = vld [vmem:[%s6586_s4 + $0x368] sm:$0xff]   ;;  %v5188_v1 = vld [vmem:[%s6586_s4 + $0x358] sm:$0xff]  }
 0x1e0   :  { %4837 = vmatprep.subr.bf16.mxu1 %v5164_v18  ;;  %v2927_v9 = vshll.u32 %v2289_v63, 16  ;;  %v2791_v39 = vshll.u32 %v6391_v19, 16  ;;  %v2758_v46 = vsel %vm39_vm0, %v2753_v6, %v2757_v7  ;;  %v2918_v26 = vsel %vm39_vm0, %v2913_v44, %v2917_v62  ;;  %v6470_v63 = vld [vmem:[#allocation2 + $0x1c] ss:$0 sps:$4 sm:$0x77]  }
 0x1e1   :  { %v2924_v41 = vrot.slane %v2922_v30, 1  ;;  %v2788_v24 = vrot.slane %v2786_v32, 1  ;;  %v2942_v27 = vsel %vm39_vm0, %v2937_v40, %v2941_v33  ;;  %v2900_v0 = vshrl.u32 %v6424_v15, 16  ;;  %v5181_v15 = vld [vmem:[%s6586_s4 + $0x328] sm:$0xff]   ;;  %v5190_v53 = vld [vmem:[%s6586_s4 + $0x318] sm:$0xff]   ;;  %v5191_v40 = vld [vmem:[%s6586_s4 + $0x350] sm:$0xff]  }
 0x1e2   :  { %4810 = vmatpush3.bf16.msra.mxu0 %v5165_v10  ;;  %v2800_v21 = vrot.slane %v2798_v38, 1  ;;  %v2803_v19 = vshll.u32 %v2390_v29, 16  ;;  %v2920_v54 = vshrl.u32 %v2290_v48, 16  ;;  %v2784_v16 = vshrl.u32 %v2365_v37, 16  ;;  %v5180_v29 = vld [vmem:[%s6586_s4 + $0x3a8] sm:$0xff]   ;;  %v5186_v48 = vld [vmem:[%s6586_s4 + $0x3a0] sm:$0xff]  }
 0x1e3   :  { %4838 = vmatpush3.bf16.msra.mxu1 %v5166_v5  ;;  %4851 = vmatprep.subr.bf16.mxu0 %v5168_v45  ;;  %v6468_v59 = vcombine.low %v2044_v52, %v6290_v4  ;;  %v2905_v14 = vor.u32 %v2904_v42, %v2900_v0  ;;  %v2796_v35 = vshrl.u32 %v2391_v31, 16  ;;  %v2929_v25 = vrot.slane %v2927_v9, 1  ;;  %v5193_v33 = vld [vmem:[%s6586_s4 + $0x310] sm:$0xff]  }
 0x1e4   :  { %4909 = vmatprep.subr.bf16.mxu1 %v5169_v13  ;;  %v2925_v23 = vor.u32 %v2924_v41, %v2920_v54  ;;  %v2789_v18 = vor.u32 %v2788_v24, %v2784_v16  ;;  %v2793_v4 = vrot.slane %v2791_v39, 1  ;;  %v2805_v51 = vrot.slane %v2803_v19, 1  ;;  %v5198_v41 = vld [vmem:[%s6586_s4 + $0x380] sm:$0xff]  }
 0x1e5   :  { %3958 = vmatmul.mubr.bf16.vlgmr.msra.gmra.mxu0 %v2734_v55  ;;  %v2801_v58 = vor.u32 %v2800_v21, %v2796_v35  ;;  %v2367_v28 = vshrl.u32 %v6468_v59, 16  ;;  %v2370_v7 = vshll.u32 %v6468_v59, 16  ;;  %v2375_v8 = vshrl.u32 %v6470_v63, 16  ;;  %v5194_v55 = vld [vmem:[%s6586_s4 + $0x348] sm:$0xff]   ;;  %v5199_v54 = vld [vmem:[%s6586_s4 + $0x300] sm:$0xff]  }
 0x1e6   :  { %4007 = vmatmul.mubr.bf16.vlgmr.msra.gmra.mxu1 %v2758_v46  ;;  %3965 = vmatprep.mubr.bf16.mxu0 %v2918_v26  ;;  %v2378_v57 = vshll.u32 %v6470_v63, 16  ;;  %v2906_v10 = vsel %vm39_vm0, %v2905_v14, %v6327_v2  ;;  %v2930_v12 = vsel %vm39_vm0, %v2925_v23, %v2929_v25  ;;  %v2794_v22 = vsel %vm39_vm0, %v2789_v18, %v2793_v4  ;;  %v5187_v2 = vld [vmem:[%s6586_s4 + $0x320] sm:$0xff]   ;;  %v5196_v26 = vld [vmem:[%s6586_s4 + $0x308] sm:$0xff]  }
 0x1e7   :  { %4014 = vmatprep.mubr.bf16.mxu1 %v2942_v27  ;;  %4852 = vmatpush3.bf16.msra.mxu0 %v5174_v3  ;;  %v2806_v5 = vsel %vm39_vm0, %v2801_v58, %v2805_v51  ;;  %v2369_v45 = vrot.slane %v2367_v28, 2  ;;  %v2372_v47 = vrot.slane %v2370_v7, 3  ;;  %v6499_v37 = vrot.slane %v2375_v8, 2 }
 0x1e8   :  { %4910 = vmatpush3.bf16.msra.mxu1 %v5169_v13  ;;  %4853 = vmatprep.subr.bf16.mxu0 %v5175_v17  ;;  %v2380_v31 = vrot.slane %v2378_v57, 3  ;;  %v5189_v13 = vld [vmem:[%s6586_s4 + $0x398] sm:$0xff]   ;;  %v2337_v62 = vrot.slane %v6275_v20, 2  ;;  %v2338_v49 = vrot.slane %v6309_v11, 2  ;;  %v2392_v6 = vrot.slane %v6468_v59, 3  ;;  %v5192_v20 = vld [vmem:[%s6586_s4 + $0x390] sm:$0xff]  }
 0x1e9   :  { %4911 = vmatprep.subr.bf16.mxu1 %v5176_v60  ;;  %v2393_v44 = vrot.slane %v5201_v34, 3  ;;  %v2373_v30 = vor.u32 %v2372_v47, %v2369_v45  ;;  %v5195_v17 = vld [vmem:[%s6586_s4 + $0x388] sm:$0xff]   ;;  %v2340_v52 = vrot.slane %v6317_v61, 2  ;;  %v2341_v46 = vrot.slane %v6470_v63, 2 }
 0x1ea   :  { %v2381_v32 = vor.u32 %v2380_v31, %v6499_v37  ;;  %v2339_v11 = vsel %vm94_vm4, %v2337_v62, %v2338_v49  ;;  %v2779_v61 = vshll.u32 %v2338_v49, 16  ;;  %v2963_v19 = vshll.u32 %v6499_v37, 16 }
 0x1eb   :  { %4854 = vmatpush3.bf16.msra.mxu0 %v5177_v36  ;;  %v2394_v38 = vsel %vm116_vm6, %v2392_v6, %v2393_v44  ;;  %v2774_v42 = vshll.u32 %v2339_v11, 16  ;;  %v2975_v27 = vshll.u32 %v2393_v44, 16  ;;  %v2342_v36 = vsel %vm94_vm4, %v2340_v52, %v2341_v46 }
 0x1ec   :  { %4912 = vmatpush3.bf16.msra.mxu1 %v5176_v60  ;;  %4855 = vmatprep.subr.bf16.mxu0 %v5179_v50  ;;  %v2382_v3 = vsel %vm101_vm3, %v2373_v30, %v2381_v32  ;;  %v2970_v9 = vshll.u32 %v2394_v38, 16  ;;  %v5197_v60 = vld [vmem:[%s6586_s4 + $0x340] sm:$0xff]   ;;  %v2772_v16 = vshrl.u32 %v2339_v11, 16  ;;  %v2968_v59 = vshrl.u32 %v2394_v38, 16 }
 0x1ed   :  { %3966 = vmatmul.mubr.bf16.gmra.mxu0 %v2906_v10  ;;  %4913 = vmatprep.subr.bf16.mxu1 %v5180_v29  ;;  %v2958_v39 = vshll.u32 %v2382_v3, 16  ;;  %v2776_v24 = vrot.slane %v2774_v42, 1  ;;  %v2956_v63 = vshrl.u32 %v2382_v3, 16  ;;  %v2781_v50 = vrot.slane %v2779_v61, 1 }
 0x1ee   :  { %4015 = vmatmul.mubr.bf16.gmra.mxu1 %v2930_v12  ;;  %4055 = vmatprep.mubr.bf16.mxu0 %v2794_v22  ;;  %v2972_v0 = vrot.slane %v2970_v9, 1  ;;  %v2946_v35 = vshll.u32 %v2342_v36, 16  ;;  %v2977_v25 = vrot.slane %v2975_v27, 1  ;;  %v2965_v18 = vrot.slane %v2963_v19, 1 }
 0x1ef   :  { %4856 = vmatpush3.bf16.msra.mxu0 %v5181_v15  ;;  %4925 = vmatprep.mubr.bf16.mxu1 %v2806_v5  ;;  %v2960_v21 = vrot.slane %v2958_v39, 1  ;;  %v2777_v14 = vor.u32 %v2776_v24, %v2772_v16  ;;  %v2951_v51 = vshll.u32 %v2341_v46, 16  ;;  %v2944_v7 = vshrl.u32 %v2342_v36, 16 }
 0x1f0   :  { %4914 = vmatpush3.bf16.msra.mxu1 %v5180_v29  ;;  %4857 = vmatprep.subr.bf16.mxu0 %v5185_v56  ;;  %v2973_v23 = vor.u32 %v2972_v0, %v2968_v59  ;;  %v2948_v58 = vrot.slane %v2946_v35, 1 }
 0x1f1   :  { %4915 = vmatprep.subr.bf16.mxu1 %v5186_v48  ;;  %v2961_v29 = vor.u32 %v2960_v21, %v2956_v63  ;;  %v2782_v4 = vsel %vm39_vm0, %v2777_v14, %v2781_v50  ;;  %v2953_v57 = vrot.slane %v2951_v51, 1 }
 0x1f2   :  { %v2978_v15 = vsel %vm39_vm0, %v2973_v23, %v2977_v25  ;;  %v2949_v8 = vor.u32 %v2948_v58, %v2944_v7 }
 0x1f3   :  { %4858 = vmatpush3.bf16.msra.mxu0 %v5187_v2  ;;  %v2966_v28 = vsel %vm39_vm0, %v2961_v29, %v2965_v18 }
 0x1f4   :  { %4916 = vmatpush3.bf16.msra.mxu1 %v5186_v48  ;;  %4859 = vmatprep.subr.bf16.mxu0 %v5188_v1  ;;  %v2954_v10 = vsel %vm39_vm0, %v2949_v8, %v2953_v57 }
 0x1f5   :  { %4917 = vmatprep.subr.bf16.mxu1 %v5189_v13 }
 0x1f7   :  { %4860 = vmatpush3.bf16.msra.mxu0 %v5190_v53 }
 0x1f8   :  { %4918 = vmatpush3.bf16.msra.mxu1 %v5189_v13  ;;  %4861 = vmatprep.subr.bf16.mxu0 %v5191_v40 }
 0x1f9   :  { %4919 = vmatprep.subr.bf16.mxu1 %v5192_v20 }
 0x1fb   :  { %4862 = vmatpush3.bf16.msra.mxu0 %v5193_v33 }
 0x1fc   :  { %4920 = vmatpush3.bf16.msra.mxu1 %v5192_v20  ;;  %4863 = vmatprep.subr.bf16.mxu0 %v5194_v55 }
 0x1fd   :  { %4921 = vmatprep.subr.bf16.mxu1 %v5195_v17 }
 0x1ff   :  { %4864 = vmatpush3.bf16.msra.mxu0 %v5196_v26 }
 0x200   :  { %4922 = vmatpush3.bf16.msra.mxu1 %v5195_v17  ;;  %4865 = vmatprep.subr.bf16.mxu0 %v5197_v60 }
 0x201   :  { %4923 = vmatprep.subr.bf16.mxu1 %v5198_v41 }
 0x203   :  { %4866 = vmatpush3.bf16.msra.mxu0 %v5199_v54 }
 0x204   :  { %4924 = vmatpush3.bf16.msra.mxu1 %v5198_v41 }
 0x206   :  { %4056 = vmatmul.mubr.bf16.vlgmr.msra.gmra.mxu0 %v2782_v4 }
 0x207   :  { %4926 = vmatmul.mubr.bf16.vlgmr.msra.gmra.mxu1 %v2978_v15  ;;  %4063 = vmatprep.mubr.bf16.mxu0 %v2966_v28 }
 0x20e   :  { %4064 = vmatmul.mubr.bf16.gmra.mxu0 %v2954_v10 }
 0x265   :  { %v4699_v56 = vpop.f32.mrf.mxu0 }
 0x266   :  { %v4727_v12 = vpop.f32.mrf.mxu1 }
 0x267   :  { %v4700_v22 = vpop.f32.mrf.mxu0 }
 0x268   :  { %v4728_v48 = vpop.f32.mrf.mxu1  ;;  %v4701_v36 = vadd.f32 %v4700_v22, %v4699_v56 }
 0x269   :  { %v4702_v5 = vpop.f32.mrf.mxu0  ;;  %v4729_v54 = vadd.f32 %v4728_v48, %v4727_v12 }
 0x26a   :  { %v4730_v2 = vpop.f32.mrf.mxu1 }
 0x26b   :  { %v4703_v34 = vpop.f32.mrf.mxu0  ;;  %v3813_v23 = vadd.f32 %v4729_v54, %v4701_v36 }
 0x26c   :  { %v4731_v45 = vpop.f32.mrf.mxu1  ;;  %v4704_v59 = vadd.f32 %v4703_v34, %v4702_v5 }
 0x26d   :  { %v4732_v63 = vadd.f32 %v4731_v45, %v4730_v2 }
 0x26f   :  { %v4705_v47 = vpop.f32.mrf.mxu0  ;;  %v3816_v29 = vadd.f32 %v4732_v63, %v4704_v59 }
 0x271   :  { %v4706_v31 = vpop.f32.mrf.mxu0 }
 0x272   :  { %v4707_v18 = vadd.f32 %v4706_v31, %v4705_v47 }
 0x273   :  { %v4708_v13 = vpop.f32.mrf.mxu0 }
 0x274   :  { %v4733_v37 = vpop.f32.mrf.mxu1 }
 0x275   :  { %v4709_v49 = vpop.f32.mrf.mxu0 }
 0x276   :  { %v4734_v1 = vpop.f32.mrf.mxu1  ;;  %v4710_v7 = vadd.f32 %v4709_v49, %v4708_v13 }
 0x277   :  { %v4735_v4 = vadd.f32 %v4734_v1, %v4733_v37 }
 0x278   :  { %v4736_v62 = vpop.f32.mrf.mxu1 }
 0x279   :  { %v3821_v56 = vadd.f32 %v4735_v4, %v4707_v18 }
 0x27a   :  { %v4737_v53 = vpop.f32.mrf.mxu1 }
 0x27b   :  { %v4738_v12 = vadd.f32 %v4737_v53, %v4736_v62 }
 0x27d   :  { %v3824_v1 = vadd.f32 %v4738_v12, %v4710_v7 }
 0x285   :  { %v4755_v6 = vpop.f32.mrf.mxu0 }
 0x286   :  { %v4783_v44 = vpop.f32.mrf.mxu1 }
 0x287   :  { %v4756_v30 = vpop.f32.mrf.mxu0 }
 0x288   :  { %v4784_v32 = vpop.f32.mrf.mxu1  ;;  %v4757_v50 = vadd.f32 %v4756_v30, %v4755_v6 }
 0x289   :  { %v4758_v40 = vpop.f32.mrf.mxu0  ;;  %v4785_v8 = vadd.f32 %v4784_v32, %v4783_v44 }
 0x28a   :  { %v4786_v20 = vpop.f32.mrf.mxu1  ;;  %v3862_v51 = vadd.f32 %v4757_v50, %v3813_v23 }
 0x28b   :  { %v4759_v11 = vpop.f32.mrf.mxu0 }
 0x28c   :  { %v4787_v33 = vpop.f32.mrf.mxu1  ;;  %v4760_v35 = vadd.f32 %v4759_v11, %v4758_v40  ;;  %v3911_v2 = vadd.f32 %v4785_v8, %v3862_v51 }
 0x28d   :  { %v4761_v38 = vpop.f32.mrf.mxu0  ;;  %v4788_v22 = vadd.f32 %v4787_v33, %v4786_v20 }
 0x28e   :  { %v4789_v3 = vpop.f32.mrf.mxu1  ;;  %v3865_v15 = vadd.f32 %v4760_v35, %v3816_v29 }
 0x28f   :  { %v4762_v55 = vpop.f32.mrf.mxu0 }
 0x290   :  { %v4790_v17 = vpop.f32.mrf.mxu1  ;;  %v4763_v28 = vadd.f32 %v4762_v55, %v4761_v38  ;;  %v3914_v45 = vadd.f32 %v4788_v22, %v3865_v15 }
 0x291   :  { %v4764_v42 = vpop.f32.mrf.mxu0  ;;  %v4791_v40 = vadd.f32 %v4790_v17, %v4789_v3 }
 0x292   :  { %v4792_v9 = vpop.f32.mrf.mxu1  ;;  %v3870_v6 = vadd.f32 %v4763_v28, %v3821_v56 }
 0x293   :  { %v4765_v39 = vpop.f32.mrf.mxu0 }
 0x294   :  { %v4793_v52 = vpop.f32.mrf.mxu1  ;;  %v4766_v30 = vadd.f32 %v4765_v39, %v4764_v42  ;;  %v3919_v38 = vadd.f32 %v4791_v40, %v3870_v6 }
 0x295   :  { %v4794_v33 = vadd.f32 %v4793_v52, %v4792_v9 }
 0x296   :  { %v3873_v62 = vadd.f32 %v4766_v30, %v3824_v1 }
 0x298   :  { %v3922_v54 = vadd.f32 %v4794_v33, %v3873_v62  ;;  %v4152_v62 = vld [vmem:[%s6590_s6] sm:$0x1] }
 0x2a5   :  { %v4811_v46 = vpop.f32.mrf.mxu0 }
 0x2a6   :  { %v4839_v26 = vpop.f32.mrf.mxu1 }
 0x2a7   :  { %v4812_v60 = vpop.f32.mrf.mxu0 }
 0x2a8   :  { %v4840_v41 = vpop.f32.mrf.mxu1  ;;  %v4813_v57 = vadd.f32 %v4812_v60, %v4811_v46 }
 0x2a9   :  { %v4814_v24 = vpop.f32.mrf.mxu0  ;;  %v4841_v44 = vadd.f32 %v4840_v41, %v4839_v26 }
 0x2aa   :  { %v4842_v61 = vpop.f32.mrf.mxu1  ;;  %v3960_v37 = vadd.f32 %v4813_v57, %v3911_v2 }
 0x2ab   :  { %v4815_v27 = vpop.f32.mrf.mxu0 }
 0x2ac   :  { %v4843_v0 = vpop.f32.mrf.mxu1  ;;  %v4816_v48 = vadd.f32 %v4815_v27, %v4814_v24  ;;  %v4009_v55 = vadd.f32 %v4841_v44, %v3960_v37  ;;  %v4148_v44 = vld [vmem:[%s6589_s5] sm:$0x1] }
 0x2ad   :  { %v4817_v21 = vpop.f32.mrf.mxu0  ;;  %v4844_v53 = vadd.f32 %v4843_v0, %v4842_v61 }
 0x2ae   :  { %v4845_v19 = vpop.f32.mrf.mxu1  ;;  %v3963_v11 = vadd.f32 %v4816_v48, %v3914_v45 }
 0x2af   :  { %v4818_v16 = vpop.f32.mrf.mxu0 }
 0x2b0   :  { %v4846_v14 = vpop.f32.mrf.mxu1  ;;  %v4819_v13 = vadd.f32 %v4818_v16, %v4817_v21  ;;  %v4012_v24 = vadd.f32 %v4844_v53, %v3963_v11 }
 0x2b1   :  { %v4820_v25 = vpop.f32.mrf.mxu0  ;;  %v4847_v3 = vadd.f32 %v4846_v14, %v4845_v19 }
 0x2b2   :  { %v4848_v58 = vpop.f32.mrf.mxu1  ;;  %v3968_v42 = vadd.f32 %v4819_v13, %v3919_v38 }
 0x2b3   :  { %v4821_v10 = vpop.f32.mrf.mxu0 }
 0x2b4   :  { %v4849_v5 = vpop.f32.mrf.mxu1  ;;  %v4822_v39 = vadd.f32 %v4821_v10, %v4820_v25  ;;  %v4017_v41 = vadd.f32 %v4847_v3, %v3968_v42 }
 0x2b5   :  { %v4850_v9 = vadd.f32 %v4849_v5, %v4848_v58 }
 0x2b6   :  { %v3971_v59 = vadd.f32 %v4822_v39, %v3922_v54  ;;  %v4158_v54 = vld [vmem:[%s6585_s0 + $0x30] sm:$0xff] }
 0x2b8   :  { %v4020_v23 = vadd.f32 %v4850_v9, %v3971_v59 }
 0x2c6   :  { %v4867_v34 = vpop.f32.mrf.mxu0 }
 0x2c7   :  { %v4927_v47 = vpop.f32.mrf.mxu1 }
 0x2c8   :  { %v4868_v31 = vpop.f32.mrf.mxu0 }
 0x2c9   :  { %v4106_v49 = vpop.f32.mrf.mxu1  ;;  %v4869_v20 = vadd.f32 %v4868_v31, %v4867_v34 }
 0x2ca   :  { %v4870_v32 = vpop.f32.mrf.mxu0 }
 0x2cb   :  { %v4928_v46 = vpop.f32.mrf.mxu1  ;;  %v4058_v17 = vadd.f32 %v4869_v20, %v4009_v55 }
 0x2cc   :  { %v4871_v60 = vpop.f32.mrf.mxu0 }
 0x2cd   :  { %v4872_v27 = vadd.f32 %v4871_v60, %v4870_v32  ;;  %v4109_v16 = vpop.f32.mrf.mxu1  ;;  %v4107_v52 = vadd.f32 %v4106_v49, %v4058_v17 }
 0x2ce   :  { %v4873_v36 = vpop.f32.mrf.mxu0 }
 0x2cf   :  { %v4061_v21 = vadd.f32 %v4872_v27, %v4012_v24  ;;  %v4130_v4 = vmul.f32 %v4107_v52, %v4107_v52  ;;  %v4156_v27 = vld [vmem:[%s6585_s0 + $0x10] sm:$0xff] }
 0x2d0   :  { %v4874_v26 = vpop.f32.mrf.mxu0 }
 0x2d1   :  { %v4110_v63 = vadd.f32 %v4109_v16, %v4061_v21  ;;  %v4875_v61 = vadd.f32 %v4874_v26, %v4873_v36  ;;  %v4157_v36 = vld [vmem:[%s6585_s0 + $0x28] sm:$0xff] }
 0x2d2   :  { %v4876_v0 = vpop.f32.mrf.mxu0 }
 0x2d3   :  { %v4066_v50 = vadd.f32 %v4875_v61, %v4017_v41  ;;  %v4131_v29 = vmul.f32 %v4110_v63, %v4110_v63  ;;  %v4121_v51 = vadd.f32 %v4110_v63, %v4107_v52 }
 0x2d4   :  { %v4877_v35 = vpop.f32.mrf.mxu0 }
 0x2d5   :  { %v4115_v25 = vadd.f32 %v4927_v47, %v4066_v50  ;;  %v4878_v18 = vadd.f32 %v4877_v35, %v4876_v0  ;;  %v4134_v15 = vadd.f32 %v4131_v29, %v4130_v4 }
 0x2d7   :  { %v4132_v19 = vmul.f32 %v4115_v25, %v4115_v25  ;;  %v4069_v14 = vadd.f32 %v4878_v18, %v4020_v23  ;;  %v4122_v28 = vadd.f32 %v4121_v51, %v4115_v25 }
 0x2d9   :  { %v4118_v7 = vadd.f32 %v4928_v46, %v4069_v14  ;;  %v4135_v8 = vadd.f32 %v4134_v15, %v4132_v19  ;;  %v4155_v46 = vld [vmem:[%s6585_s0 + $0x8] sm:$0xff] }
 0x2db   :  { %v4123_v57 = vadd.f32 %v4122_v28, %v4118_v7  ;;  %v4133_v10 = vmul.f32 %v4118_v7, %v4118_v7 }
 0x2dd   :  { %v4124_v56 = vrot.slane %v4123_v57, 4  ;;  %v4136_v12 = vadd.f32 %v4135_v8, %v4133_v10 }
 0x2df   :  { %v4125_v58 = vadd.f32 %v4124_v56, %v4123_v57  ;;  %v4137_v22 = vrot.slane %v4136_v12, 4 }
 0x2e1   :  { %v4126_v48 = vrot.slane %v4125_v58, 2  ;;  %v4138_v5 = vadd.f32 %v4137_v22, %v4136_v12 }
 0x2e3   :  { %v4127_v2 = vadd.f32 %v4126_v48, %v4125_v58  ;;  %v4139_v34 = vrot.slane %v4138_v5, 2 }
 0x2e5   :  { %v4128_v45 = vrot.slane %v4127_v2, 1  ;;  %v4140_v6 = vadd.f32 %v4139_v34, %v4138_v5 }
 0x2e7   :  { %v4129_v30 = vadd.f32 %v4128_v45, %v4127_v2  ;;  %v4141_v47 = vrot.slane %v4140_v6, 1 }
 0x2e9   :  { %v4142_v37 = vadd.f32 %v4141_v47, %v4140_v6  ;;  %v4143_v31 = vmul.f32 0.03125, %v4129_v30 }
 0x2eb   :  { %v4144_v1 = vmul.f32 0.03125, %v4142_v37  ;;  %v4145_v40 = vmul.f32 %v4143_v31, %v4143_v31 }
 0x2ed   :  { %v4146_v11 = vsub.f32 %v4144_v1, %v4145_v40 }
 0x2ef   :  { %v4147_v13 = vmax.f32 %v4146_v11, 0.0 }
 0x2f1   :  { %v4149_v49 = vadd.f32 1e-05, %v4147_v13 }
 0x2f3   :  { %5205 = vrsqrt.f32 %v4149_v49 }
 0x300   :  { %v5206_v32 = vpop.eup %5205 }
 0x301   :  { %v4151_v38 = vmul.f32 %v5206_v32, %v4148_v44 }
 0x303   :  { %v4153_v53 = vmul.f32 %v4151_v38, %v4143_v31  ;;  %v4163_v20 = vrot.slane %v4151_v38, %v6018_v43 }
 0x305   :  { %v4154_v33 = vsub.f32 %v4152_v62, %v4153_v53  ;;  %v4165_v55 = vmul.f32 %v4163_v20, %v4107_v52  ;;  %v4166_v60 = vmul.f32 %v4163_v20, %v4110_v63  ;;  %v4167_v24 = vmul.f32 %v4163_v20, %v4115_v25 }
 0x306   :  { %v4168_v42 = vmul.f32 %v4163_v20, %v4118_v7 }
 0x307   :  { %v4173_v39 = vrot.slane %v4154_v33, %v6018_v43 }
 0x309   :  { %v4175_v3 = vadd.f32 %v4173_v39, %v4165_v55  ;;  %v4176_v17 = vadd.f32 %v4173_v39, %v4166_v60  ;;  %v4177_v21 = vadd.f32 %v4173_v39, %v4167_v24  ;;  %v4178_v16 = vadd.f32 %v4173_v39, %v4168_v42 }
 0x30b   :  { %v4179_v26 = vadd.f32 %v4175_v3, %v4155_v46  ;;  %v4180_v41 = vadd.f32 %v4176_v17, %v4156_v27  ;;  %v4181_v59 = vadd.f32 %v4177_v21, %v4157_v36  ;;  %v4182_v43 = vadd.f32 %v4178_v16, %v4158_v54 }
 0x30d   :  { %v4183_v63 = vmax.f32 %v4179_v26, 0.0  ;;  %v4184_v61 = vmax.f32 %v4180_v41, 0.0  ;;  %v4185_v0 = vmax.f32 %v4181_v59, 0.0  ;;  %v4186_v9 = vmax.f32 %v4182_v43, 0.0 }
 0x30f   :  { %4187 = vst [vmem:[%s6591_s7] sm:$0xff] %v4183_v63  ;;  %4188 = vst [vmem:[%s6591_s7 + $0x8] sm:$0xff] %v4184_v61 }
 0x310   :  { %4189 = vst [vmem:[%s6591_s7 + $0x10] sm:$0xff] %v4185_v0  ;;  %4190 = vst [vmem:[%s6591_s7 + $0x18] sm:$0xff] %v4186_v9 }

</bundles_post_ra>
